<compile_context>
chip_gen: v7x
topology: tpu7x:2x2x1
jax: 0.10.0
libtpu: 0.0.40
codegen_flags: <defaults>
</compile_context>

<pallas_src>
import functools
import math

import jax
import jax.numpy as jnp
from jax.experimental import pallas as pl
from jax.experimental.pallas import tpu as pltpu


# ---------------------------------------------------------------------------
# Hardware query helpers.
# ---------------------------------------------------------------------------
def _vmem_capacity_bytes():
    try:
        return int(pltpu.get_tpu_info().vmem_capacity_bytes)
    except Exception:
        return 64 * 2 ** 20          # conservative (v7x-sized) fallback


# ---------------------------------------------------------------------------
# Single-pass kernel: ChannelAttention fused with the SFF combination.
# Block = (bt, C, HW) -- whole spatial extent resident, one HBM pass per tensor.
# ---------------------------------------------------------------------------
def _sff_ca_fuse_kernel(xh_ref, xl_ref, w1t_ref, w2t_ref, o_ref, *, hw):
    # xh_ref / xl_ref / o_ref: (bt, C, HW)   w1t_ref: (C, Cr)   w2t_ref: (Cr, C)
    xh = xh_ref[...]                                   # native dtype, single load
    bt, c, _ = xh.shape

    # --- pooled stats: f32 accumulation, no full-block f32 copy for bf16 ----
    if xh.dtype == jnp.float32:
        s = jnp.sum(xh, axis=-1)                                       # (bt, C)
    else:
        # chunked upcast -> accumulate, avoids materializing a full f32 block
        s = jnp.zeros((bt, c), jnp.float32)
        chunk = 2048
        for s0 in range(0, hw, chunk):
            s = s + jnp.sum(xh[:, :, s0:min(s0 + chunk, hw)].astype(jnp.float32),
                            axis=-1)
    avg = s * (1.0 / hw)                                               # (bt, C)
    mx = jnp.max(xh, axis=-1).astype(jnp.float32)                      # (bt, C)

    # --- shared-weight MLP: avg & max branches of every folded batch, 1 pass -
    p = jnp.concatenate([avg, mx], axis=0)                             # (2bt, C)
    h = jnp.maximum(
        jnp.dot(p, w1t_ref[...], preferred_element_type=jnp.float32,
                precision=jax.lax.Precision.HIGHEST), 0.0)             # (2bt, Cr)
    y = jnp.dot(h, w2t_ref[...], preferred_element_type=jnp.float32,
                precision=jax.lax.Precision.HIGHEST)                   # (2bt, C)
    att = jax.nn.sigmoid(y[:bt] + y[bt:]).astype(o_ref.dtype)          # (bt, C)

    # --- fused SFF output: f_low * (att * f_high) + f_high, native dtype -----
    ca = att[:, :, None] * xh
    o_ref[...] = xl_ref[...] * ca + xh


def _sff_single_pass(xh, xl, w1t, w2t, *, vmem_budget, target_block):
    B, C, HW = xh.shape
    Cr = w1t.shape[1]
    itemsize = jnp.dtype(xh.dtype).itemsize
    per_batch = C * HW * itemsize

    # Fold small batch elements into one block (bigger DMAs), but keep at least
    # min(B, 4) grid steps so the BlockSpec pipeline actually overlaps.
    bt = max(1, min(B, target_block // max(per_batch, 1)))
    min_steps = min(B, 4)
    bt = min(bt, max(1, B // min_steps))
    while B % bt:
        bt -= 1

    block_bytes = bt * per_batch
    w_bytes = (w1t.size + w2t.size) * jnp.dtype(w1t.dtype).itemsize
    # 2 inputs + 1 output double-buffered (6 blocks) + ~2 block-sized
    # elementwise temporaries + resident weights + slack, clamped to physical.
    vmem_limit = int(min(vmem_budget,
                         max(32 * 2 ** 20,
                             9 * block_bytes + 4 * w_bytes + 4 * 2 ** 20)))

    kernel = functools.partial(_sff_ca_fuse_kernel, hw=HW)
    return pl.pallas_call(
        kernel,
        out_shape=jax.ShapeDtypeStruct((B, C, HW), xh.dtype),
        grid_spec=pltpu.PrefetchScalarGridSpec(
            num_scalar_prefetch=0,
            grid=(B // bt,),
            in_specs=[
                pl.BlockSpec((bt, C, HW), lambda b: (b, 0, 0)),
                pl.BlockSpec((bt, C, HW), lambda b: (b, 0, 0)),
                pl.BlockSpec((C, Cr), lambda b: (0, 0)),
                pl.BlockSpec((Cr, C), lambda b: (0, 0)),
            ],
            out_specs=pl.BlockSpec((bt, C, HW), lambda b: (b, 0, 0)),
        ),
        compiler_params=pltpu.CompilerParams(
            dimension_semantics=("parallel",),
            vmem_limit_bytes=vmem_limit,
        ),
        input_output_aliases={0: 0},           # donate f_high_resized's buffer
        cost_estimate=pl.CostEstimate(
            flops=5 * B * C * HW + 8 * B * C * Cr,
            transcendentals=B * C,
            bytes_accessed=3 * B * C * HW * itemsize + 2 * C * Cr * itemsize),
    )(xh, xl, w1t, w2t)


# ---------------------------------------------------------------------------
# Two-pass HW-tiled path (large feature maps / v7x 64 MiB VMEM).
# Pass 1: per-batch sum/max accumulation over hw tiles + MLP on the last tile.
# Pass 2: re-stream tiles applying xl * att * xh + xh.
# ---------------------------------------------------------------------------
def _ca_stats_kernel(xh_ref, w1t_ref, w2t_ref, att_ref, sum_sc, max_sc, *, hw, thw):
    # xh_ref: (1, C, thw)   att_ref: (1, C, 1)   sum_sc/max_sc: (1, C) f32
    t = pl.program_id(1)
    n_t = pl.num_programs(1)

    @pl.when(t == 0)
    def _():
        sum_sc[...] = jnp.zeros_like(sum_sc)
        max_sc[...] = jnp.full_like(max_sc, -jnp.inf)

    xh = xh_ref[...]
    if hw % thw != 0:
        # Only the last tile is ragged; mask out-of-bounds lanes (floats only).
        start = t * thw
        lane = jax.lax.broadcasted_iota(jnp.int32, xh.shape, 2)
        valid = (start + lane) < hw
        neg = jnp.asarray(jnp.finfo(xh.dtype).min, xh.dtype)
        x_sum_src = jnp.where(valid, xh, jnp.zeros((), xh.dtype))
        x_max_src = jnp.where(valid, xh, neg)
    else:
        x_sum_src = xh
        x_max_src = xh

    sum_sc[...] += jnp.sum(x_sum_src, axis=-1, dtype=jnp.float32)          # (1, C)
    max_sc[...] = jnp.maximum(max_sc[...],
                              jnp.max(x_max_src, axis=-1).astype(jnp.float32))

    @pl.when(t == n_t - 1)
    def _():
        avg = sum_sc[...] * (1.0 / hw)                                     # (1, C)
        mx = max_sc[...]                                                   # (1, C)
        p = jnp.concatenate([avg, mx], axis=0)                             # (2, C)
        h = jnp.maximum(
            jnp.dot(p, w1t_ref[...], preferred_element_type=jnp.float32,
                    precision=jax.lax.Precision.HIGHEST), 0.0)             # (2, Cr)
        y = jnp.dot(h, w2t_ref[...], preferred_element_type=jnp.float32,
                    precision=jax.lax.Precision.HIGHEST)                   # (2, C)
        att = jax.nn.sigmoid(y[0:1] + y[1:2])                              # (1, C)
        att_ref[...] = att[:, :, None]                                     # (1, C, 1)


def _sff_apply_kernel(xh_ref, xl_ref, att_ref, o_ref):
    xh = xh_ref[...]                                    # (1, C, thw)
    att = att_ref[...].astype(xh.dtype)                 # (1, C, 1)
    o_ref[...] = xl_ref[...] * (att * xh) + xh


def _sff_two_pass(xh, xl, w1t, w2t, *, vmem_budget, hw_tile):
    B, C, HW = xh.shape
    Cr = w1t.shape[1]
    itemsize = jnp.dtype(xh.dtype).itemsize

    if hw_tile is None:
        tile_target = 2 * 2 ** 20                      # ~2 MiB per (1, C, thw) tile
        thw = max(128, (tile_target // max(C * itemsize, 1)) // 128 * 128)
    else:
        thw = int(hw_tile)
    if thw >= HW:
        thw = HW                                       # full-extent block always legal
    n_hw = pl.cdiv(HW, thw)
    tile_bytes = C * thw * itemsize

    # ---- pass 1: attention weights (B, C, 1), f32 ----
    att = pl.pallas_call(
        functools.partial(_ca_stats_kernel, hw=HW, thw=thw),
        out_shape=jax.ShapeDtypeStruct((B, C, 1), jnp.float32),
        grid_spec=pltpu.PrefetchScalarGridSpec(
            num_scalar_prefetch=0,
            grid=(B, n_hw),
            in_specs=[
                pl.BlockSpec((1, C, thw), lambda b, t: (b, 0, t)),
                pl.BlockSpec((C, Cr), lambda b, t: (0, 0)),
                pl.BlockSpec((Cr, C), lambda b, t: (0, 0)),
            ],
            out_specs=pl.BlockSpec((1, C, 1), lambda b, t: (b, 0, 0)),
            scratch_shapes=[pltpu.VMEM((1, C), jnp.float32),
                            pltpu.VMEM((1, C), jnp.float32)],
        ),
        compiler_params=pltpu.CompilerParams(
            dimension_semantics=("parallel", "arbitrary"),
            vmem_limit_bytes=int(min(vmem_budget,
                                     max(32 * 2 ** 20, 6 * tile_bytes + 8 * 2 ** 20))),
        ),
        cost_estimate=pl.CostEstimate(
            flops=2 * B * C * HW + 8 * B * C * Cr,
            transcendentals=B * C,
            bytes_accessed=B * C * HW * itemsize + 2 * C * Cr * itemsize),
    )(xh, w1t, w2t)

    # ---- pass 2: apply xl * att * xh + xh, streaming tiles ----
    return pl.pallas_call(
        _sff_apply_kernel,
        out_shape=jax.ShapeDtypeStruct((B, C, HW), xh.dtype),
        grid_spec=pltpu.PrefetchScalarGridSpec(
            num_scalar_prefetch=0,
            grid=(B, n_hw),
            in_specs=[
                pl.BlockSpec((1, C, thw), lambda b, t: (b, 0, t)),
                pl.BlockSpec((1, C, thw), lambda b, t: (b, 0, t)),
                pl.BlockSpec((1, C, 1), lambda b, t: (b, 0, 0)),
            ],
            out_specs=pl.BlockSpec((1, C, thw), lambda b, t: (b, 0, t)),
        ),
        compiler_params=pltpu.CompilerParams(
            dimension_semantics=("parallel", "parallel"),
            vmem_limit_bytes=int(min(vmem_budget,
                                     max(32 * 2 ** 20, 10 * tile_bytes + 8 * 2 ** 20))),
        ),
        input_output_aliases={0: 0},
        cost_estimate=pl.CostEstimate(
            flops=3 * B * C * HW,
            transcendentals=0,
            bytes_accessed=3 * B * C * HW * itemsize),
    )(xh, xl, att)


# ---------------------------------------------------------------------------
# Dispatcher: pick single-pass (small maps) or HW-tiled two-pass (large maps).
# ---------------------------------------------------------------------------
def sff_attention_fuse(f_high_resized, f_low, w1t, w2t, *,
                       force_two_pass=False, hw_tile=None):
    """f_high_resized/f_low: (B, C, H, W); w1t: (C, C//r); w2t: (C//r, C)."""
    B, C, H, W = f_high_resized.shape
    HW = H * W
    xh = f_high_resized.reshape(B, C, HW)     # free reshape (row-major)
    xl = f_low.reshape(B, C, HW)

    vmem_cap = _vmem_capacity_bytes()
    vmem_budget = max(32 * 2 ** 20, vmem_cap - 8 * 2 ** 20)   # leave headroom
    # chip-dependent per-block byte target
    target_block = 8 * 2 ** 20 if vmem_cap >= 100 * 2 ** 20 else 4 * 2 ** 20

    itemsize = jnp.dtype(xh.dtype).itemsize
    per_batch = C * HW * itemsize
    w_bytes = (w1t.size + w2t.size) * jnp.dtype(w1t.dtype).itemsize
    single_pass_need = 9 * per_batch + 4 * w_bytes + 4 * 2 ** 20

    if force_two_pass or single_pass_need > vmem_budget:
        out = _sff_two_pass(xh, xl, w1t, w2t,
                            vmem_budget=vmem_budget, hw_tile=hw_tile)
    else:
        out = _sff_single_pass(xh, xl, w1t, w2t,
                               vmem_budget=vmem_budget, target_block=target_block)
    return out.reshape(B, C, H, W)


# ---------------------------------------------------------------------------
# XLA helpers for the rest of SFFModule.forward (deconv + bilinear resize).
# ---------------------------------------------------------------------------
def conv_transpose2d_s2k3p1op1(x, weight, bias):
    """PyTorch ConvTranspose2d(k=3, stride=2, padding=1, output_padding=1).

    weight: (C_in, C_out, 3, 3) in PyTorch ConvTranspose2d layout.
    """
    rhs = jnp.flip(weight, axis=(2, 3)).transpose(1, 0, 2, 3)   # (C_out, C_in, 3, 3)
    out = jax.lax.conv_general_dilated(
        x, rhs,
        window_strides=(1, 1),
        padding=((1, 2), (1, 2)),            # k-1-p = 1 low, +output_padding high
        lhs_dilation=(2, 2),
        rhs_dilation=(1, 1),
        dimension_numbers=("NCHW", "OIHW", "NCHW"),
        precision=jax.lax.Precision.HIGHEST,
    )
    return out + bias[None, :, None, None]


def bilinear_resize_align_corners(x, out_h, out_w):
    """F.interpolate(mode='bilinear', align_corners=True) for NCHW tensors."""
    B, C, H, W = x.shape
    if (H, W) == (out_h, out_w):
        return x
    dtype = x.dtype
    xf = x.astype(jnp.float32)
    ys = jnp.linspace(0.0, H - 1.0, out_h) if out_h > 1 else jnp.zeros((1,), jnp.float32)
    xs = jnp.linspace(0.0, W - 1.0, out_w) if out_w > 1 else jnp.zeros((1,), jnp.float32)
    y0 = jnp.clip(jnp.floor(ys), 0, H - 1).astype(jnp.int32)
    y1 = jnp.minimum(y0 + 1, H - 1)
    wy = (ys - y0.astype(jnp.float32))[None, None, :, None]
    x0 = jnp.clip(jnp.floor(xs), 0, W - 1).astype(jnp.int32)
    x1 = jnp.minimum(x0 + 1, W - 1)
    wx = (xs - x0.astype(jnp.float32))[None, None, None, :]
    r0 = jnp.take(xf, y0, axis=2)
    r1 = jnp.take(xf, y1, axis=2)
    rows = r0 * (1.0 - wy) + r1 * wy
    c0 = jnp.take(rows, x0, axis=3)
    c1 = jnp.take(rows, x1, axis=3)
    return (c0 * (1.0 - wx) + c1 * wx).astype(dtype)


@functools.partial(jax.jit, static_argnames=("force_two_pass", "hw_tile"))
def sff_forward(f_high, f_low, deconv_w, deconv_b, w1t, w2t,
                force_two_pass=False, hw_tile=None):
    """Full SFFModule.forward; ChannelAttention + fusion run in Pallas kernels."""
    f_high_ = conv_transpose2d_s2k3p1op1(f_high, deconv_w, deconv_b)
    f_high_resized = bilinear_resize_align_corners(f_high_, f_low.shape[2], f_low.shape[3])
    return sff_attention_fuse(f_high_resized, f_low, w1t, w2t,
                              force_two_pass=force_two_pass, hw_tile=hw_tile)


# ---------------------------------------------------------------------------
# Pure-JAX reference mirroring the PyTorch forward.
# ---------------------------------------------------------------------------
def sff_forward_ref(f_high, f_low, deconv_w, deconv_b, w1, w2):
    f_high_ = conv_transpose2d_s2k3p1op1(f_high, deconv_w, deconv_b)
    fhr = bilinear_resize_align_corners(f_high_, f_low.shape[2], f_low.shape[3])
    xf = fhr.astype(jnp.float32)
    avg = jnp.mean(xf, axis=(2, 3))                       # (B, C)
    mx = jnp.max(xf, axis=(2, 3))                         # (B, C)
    hp = jax.lax.Precision.HIGHEST

    def mlp(p):
        h = jnp.maximum(jnp.einsum("rc,bc->br", w1, p, precision=hp), 0.0)
        return jnp.einsum("cr,br->bc", w2, h, precision=hp)

    att = jax.nn.sigmoid(mlp(avg) + mlp(mx))[:, :, None, None]
    ca_weight = att * xf
    return (f_low.astype(jnp.float32) * ca_weight + xf).astype(f_low.dtype)


def xavier_uniform(key, shape):
    # Conv2d 1x1 weight (out, in): fan_in = in, fan_out = out.
    fan_out, fan_in = shape[0], shape[1]
    bound = (6.0 / (fan_in + fan_out)) ** 0.5
    return jax.random.uniform(key, shape, jnp.float32, -bound, bound)


if __name__ == "__main__":
    # SFFModule hard-wires the deconv to 256 channels, so C = 256.
    B, C = 2, 256
    Hh = Wh = 8              # f_high spatial
    Hl = Wl = 16             # f_low spatial (deconv doubles 8 -> 16, resize is identity)
    ratio = 4
    Cr = C // ratio

    key = jax.random.PRNGKey(0)
    kfh, kfl, kdw, kdb, k1, k2 = jax.random.split(key, 6)

    f_high = jax.random.normal(kfh, (B, C, Hh, Wh), jnp.float32)
    f_low = jax.random.normal(kfl, (B, C, Hl, Wl), jnp.float32)

    dbound = 1.0 / math.sqrt(C * 9)
    deconv_w = jax.random.uniform(kdw, (C, C, 3, 3), jnp.float32, -dbound, dbound)
    deconv_b = jax.random.uniform(kdb, (C,), jnp.float32, -dbound, dbound)
    w1 = xavier_uniform(k1, (Cr, C))   # ca.conv1.weight squeezed from (Cr, C, 1, 1)
    w2 = xavier_uniform(k2, (C, Cr))   # ca.conv2.weight squeezed from (C, Cr, 1, 1)

    # Pre-transpose the MLP weights ONCE outside the jitted call.
    w1t = jnp.transpose(w1)            # (C, Cr)
    w2t = jnp.transpose(w2)            # (Cr, C)

    ref = sff_forward_ref(f_high, f_low, deconv_w, deconv_b, w1, w2)

    # Single-pass fused path (small feature maps).
    out = sff_forward(f_high, f_low, deconv_w, deconv_b, w1t, w2t)
    out = jax.block_until_ready(out)
    assert out.shape == f_low.shape
    assert jnp.allclose(out, ref, atol=5e-4, rtol=5e-4), \
        float(jnp.max(jnp.abs(out - ref)))

    # Two-pass HW-tiled path (the v7x / large-feature-map path), forced here on
    # small shapes with a 128-lane tile to exercise init/accumulate/finalize.
    out2 = sff_forward(f_high, f_low, deconv_w, deconv_b, w1t, w2t,
                       force_two_pass=True, hw_tile=128)
    out2 = jax.block_until_ready(out2)
    assert jnp.allclose(out2, ref, atol=5e-4, rtol=5e-4), \
        float(jnp.max(jnp.abs(out2 - ref)))

    print("KERNEL_OK")
</pallas_src>

<mosaic_0001>
module attributes {stable_mosaic.version = 11 : i64} {
  func.func @_sff_ca_fuse_kernel(%arg0: i32, %arg1: memref<1x256x256xf32, #tpu.memory_space<vmem>>, %arg2: memref<1x256x256xf32, #tpu.memory_space<vmem>>, %arg3: memref<256x64xf32, #tpu.memory_space<vmem>>, %arg4: memref<64x256xf32, #tpu.memory_space<vmem>>, %arg5: memref<1x256x256xf32, #tpu.memory_space<vmem>>) attributes {dimension_semantics = [#tpu.dimension_semantics<parallel>], iteration_bounds = array<i64: 2>, scalar_prefetch = 0 : i64, scratch_operands = 0 : i64, tpu.core_type = #tpu.core_type<tc>, window_params = [{transform_indices = @transform_0, window_bounds = array<i64: 1, 256, 256>}, {transform_indices = @transform_1, window_bounds = array<i64: 1, 256, 256>}, {pipeline_mode = #tpu.pipeline_mode<synchronous>, transform_indices = @transform_2, window_bounds = array<i64: 256, 64>}, {pipeline_mode = #tpu.pipeline_mode<synchronous>, transform_indices = @transform_3, window_bounds = array<i64: 64, 256>}, {transform_indices = @transform_4, window_bounds = array<i64: 1, 256, 256>}]} {
    %c0 = arith.constant 0 : index
    %c0_0 = arith.constant 0 : index
    %c0_1 = arith.constant 0 : index
    %0 = vector.load %arg1[%c0, %c0_0, %c0_1] : memref<1x256x256xf32, #tpu.memory_space<vmem>>, vector<1x256x256xf32>
    %cst = arith.constant dense<0.000000e+00> : vector<1x256xf32>
    %1 = vector.multi_reduction <add>, %0, %cst [2] : vector<1x256x256xf32> to vector<1x256xf32>
    %cst_2 = arith.constant 3.906250e-03 : f32
    %2 = vector.broadcast %cst_2 : f32 to vector<1x256xf32>
    %3 = arith.mulf %1, %2 : vector<1x256xf32>
    %cst_3 = arith.constant dense<0xFF800000> : vector<1x256xf32>
    %4 = vector.multi_reduction <maximumf>, %0, %cst_3 [2] : vector<1x256x256xf32> to vector<1x256xf32>
    %5 = tpu.concatenate %3, %4 in 0 : vector<1x256xf32>, vector<1x256xf32> -> vector<2x256xf32>
    %c0_4 = arith.constant 0 : index
    %c0_5 = arith.constant 0 : index
    %6 = vector.load %arg3[%c0_4, %c0_5] : memref<256x64xf32, #tpu.memory_space<vmem>>, vector<256x64xf32>
    %cst_6 = arith.constant dense<0.000000e+00> : vector<2x64xf32>
    %7 = tpu.matmul %5, %6, %cst_6 {dimension_numbers = #tpu.dot_dimension_numbers<[1], [0], [0], [1], [0, 0, 1, 1], [], []>, precision = #tpu.contract_precision<fp32>} : vector<2x256xf32>, vector<256x64xf32>, vector<2x64xf32> -> vector<2x64xf32>
    %cst_7 = arith.constant 0.000000e+00 : f32
    %8 = vector.broadcast %cst_7 : f32 to vector<2x64xf32>
    %9 = arith.maximumf %7, %8 : vector<2x64xf32>
    %c0_8 = arith.constant 0 : index
    %c0_9 = arith.constant 0 : index
    %10 = vector.load %arg4[%c0_8, %c0_9] : memref<64x256xf32, #tpu.memory_space<vmem>>, vector<64x256xf32>
    %cst_10 = arith.constant dense<0.000000e+00> : vector<2x256xf32>
    %11 = tpu.matmul %9, %10, %cst_10 {dimension_numbers = #tpu.dot_dimension_numbers<[1], [0], [0], [1], [0, 0, 1, 1], [], []>, precision = #tpu.contract_precision<fp32>} : vector<2x64xf32>, vector<64x256xf32>, vector<2x256xf32> -> vector<2x256xf32>
    %12 = vector.extract_strided_slice %11 {offsets = [0, 0], sizes = [1, 256], strides = [1, 1]} : vector<2x256xf32> to vector<1x256xf32>
    %13 = vector.extract_strided_slice %11 {offsets = [1, 0], sizes = [1, 256], strides = [1, 1]} : vector<2x256xf32> to vector<1x256xf32>
    %14 = arith.addf %12, %13 : vector<1x256xf32>
    %15 = arith.negf %14 : vector<1x256xf32>
    %16 = math.exp %15 : vector<1x256xf32>
    %cst_11 = arith.constant 1.000000e+00 : f32
    %17 = vector.broadcast %cst_11 : f32 to vector<1x256xf32>
    %18 = arith.addf %17, %16 : vector<1x256xf32>
    %19 = arith.divf %17, %18 : vector<1x256xf32>
    %20 = vector.shape_cast %19 : vector<1x256xf32> to vector<1x256x1xf32>
    %21 = vector.broadcast %20 : vector<1x256x1xf32> to vector<1x256x256xf32>
    %22 = arith.mulf %21, %0 : vector<1x256x256xf32>
    %c0_12 = arith.constant 0 : index
    %c0_13 = arith.constant 0 : index
    %c0_14 = arith.constant 0 : index
    %23 = vector.load %arg2[%c0_12, %c0_13, %c0_14] : memref<1x256x256xf32, #tpu.memory_space<vmem>>, vector<1x256x256xf32>
    %24 = arith.mulf %23, %22 : vector<1x256x256xf32>
    %25 = arith.addf %24, %0 : vector<1x256x256xf32>
    %c0_15 = arith.constant 0 : index
    %c0_16 = arith.constant 0 : index
    %c0_17 = arith.constant 0 : index
    %26 = vector.load %arg5[%c0_15, %c0_16, %c0_17] : memref<1x256x256xf32, #tpu.memory_space<vmem>>, vector<1x256x256xf32>
    tpu.vector_store %arg5[%c0_15, %c0_16, %c0_17], %25 {strides = array<i32>} : memref<1x256x256xf32, #tpu.memory_space<vmem>>, vector<1x256x256xf32>,
    return
  }
  func.func @transform_0(%arg0: i32) -> (i32, i32, i32) {
    %c0_i32 = arith.constant 0 : i32
    %c0_i32_0 = arith.constant 0 : i32
    %c0_i32_1 = arith.constant 0 : i32
    return %arg0, %c0_i32, %c0_i32_0 : i32, i32, i32
  }
  func.func @transform_1(%arg0: i32) -> (i32, i32, i32) {
    %c0_i32 = arith.constant 0 : i32
    %c0_i32_0 = arith.constant 0 : i32
    %c0_i32_1 = arith.constant 0 : i32
    return %arg0, %c0_i32, %c0_i32_0 : i32, i32, i32
  }
  func.func @transform_2(%arg0: i32) -> (i32, i32) {
    %c0_i32 = arith.constant 0 : i32
    %c0_i32_0 = arith.constant 0 : i32
    %c0_i32_1 = arith.constant 0 : i32
    return %c0_i32, %c0_i32_0 : i32, i32
  }
  func.func @transform_3(%arg0: i32) -> (i32, i32) {
    %c0_i32 = arith.constant 0 : i32
    %c0_i32_0 = arith.constant 0 : i32
    %c0_i32_1 = arith.constant 0 : i32
    return %c0_i32, %c0_i32_0 : i32, i32
  }
  func.func @transform_4(%arg0: i32) -> (i32, i32, i32) {
    %c0_i32 = arith.constant 0 : i32
    %c0_i32_0 = arith.constant 0 : i32
    %c0_i32_1 = arith.constant 0 : i32
    return %arg0, %c0_i32, %c0_i32_0 : i32, i32, i32
  }
}

</mosaic_0001>

<bundles_post_ra>
// kernel: sff_forward.1
= control target key start
LH: loop header
LB: loop body
LE: loop exit
PB: predicated region body
PF: predicated region fallthrough
CT: control target
= control target key end

     0   :  { %s3613_s15 = smov 0   ;;  %s5214_s0 = inlined_call_operand.vmem [shape: f32[2,256,256], index: 0, kind: input, shape index: {}, may-alias: {0,4}]   ;;  %s5215_s1 = inlined_call_operand.vmem [shape: f32[2,256,256], index: 1, kind: input, shape index: {}]   ;;  %s5216_s2 = inlined_call_operand.vmem [shape: f32[256,64], index: 2, kind: input, shape index: {}]   ;;  %s5217_s3 = inlined_call_operand.vmem [shape: f32[64,256], index: 3, kind: input, shape index: {}]   ;;  %s5218_s4 = inlined_call_operand.vmem [shape: f32[2,256,256], index: 4, kind: output, shape index: {}, may-alias: {0,4}]  }
   0x1 LB: > { %s3028_s16 = sadd.s32 4294967295, %s3585_s15   ;;  %p3032_p0 = scmp.ge.s32.totalorder %s3585_s15, 1  ;;  %s3585_s15 = sphi %s3613_s15, %s14_s15  }
   0x2   : > { %p172_p1 = scmp.lt.s32.totalorder %s3585_s15, 3 }
   0x4   : > { %p173_p2 = pnand %p3032_p0, %p172_p1 }
   0x6   : > { %176 = sbr.rel (%p173_p2) target bundleno = 1116 (0x45c), region = 36 }
   0xd   : > { %p203_p3 = scmp.lt.s32.totalorder %s3028_s16, 1  ;;  %vm549_vm0 = vcmask 130112   ;;  %vm556_vm1 = vcmask 195712   ;;  %vm563_vm2 = vcmask 261312   ;;  %vm570_vm3 = vcmask 326912  }
   0xe   : > { %vm577_vm4 = vcmask 392512   ;;  %vm584_vm5 = vcmask 458112   ;;  %vm591_vm6 = vcmask 523712   ;;  %vm598_vm7 = vcmask 589312  }
   0xf   : > { %s5577_s16 = smov (!%p203_p3, %s3028_s16), 1  ;;  %vm605_vm8 = vcmask 654912   ;;  %vm612_vm9 = vcmask 720512   ;;  %vm619_vm10 = vcmask 786112   ;;  %vm626_vm11 = vcmask 851712  }
  0x10   : > { %s3621_s17 = sshll.u32 %s5577_s16, 9  ;;  %vm633_vm12 = vcmask 917312   ;;  %vm640_vm13 = vcmask 982912   ;;  %vm647_vm14 = vcmask 1048512   ;;  %vm922_vm15 = vcmask 1040384  }
  0x11   : > { %s3627_s20 = scalar_lea.vmem %s5214_s0, %s3621_s17  ;;  %s4955_s27 = scalar_lea.vmem %s5215_s1, %s3621_s17 }
  0x12   : > { %v3630_v0 = vld [vmem:[%s3627_s20 + $0x100] sm:$0xff]  ;;  %v3633_v1 = vld [vmem:[%s3627_s20 + $0x108] sm:$0xff]  ;;  %v3640_v5 = vld [vmem:[%s3627_s20 + $0x110] sm:$0xff]  ;;  %s4969_s30 = scalar_lea.vmem %s5218_s4, %s3621_s17 }
  0x13   : > { %5378 = vst [vmem:[#allocation2_spill] sm:$0xff] %v3630_v0  ;;  %5379 = vst [vmem:[#allocation3_spill] sm:$0xff] %v3633_v1  ;;  %v218_v2 = vld [vmem:[%s3627_s20] sm:$0xff]  ;;  %v330_v3 = vadd.f32 %v3633_v1, %v3630_v0  ;;  %v219_v4 = vld [vmem:[%s3627_s20 + $0x8] sm:$0xff]  ;;  %v458_v21 = vmax.f32 %v3630_v0, %v3633_v1 }
  0x14   : > { %5380 = vst [vmem:[#allocation4_spill] sm:$0xff] %v3640_v5  ;;  %v3643_v6 = vld [vmem:[%s3627_s20 + $0x118] sm:$0xff]  ;;  %v282_v7 = vadd.f32 %v219_v4, %v218_v2  ;;  %v220_v8 = vld [vmem:[%s3627_s20 + $0x10] sm:$0xff]  ;;  %v3650_v12 = vld [vmem:[%s3627_s20 + $0x120] sm:$0xff]  ;;  %v410_v29 = vmax.f32 %v218_v2, %v219_v4 }
  0x15   : > { %5381 = vst [vmem:[#allocation5_spill] sm:$0xff] %v3643_v6  ;;  %v221_v9 = vld [vmem:[%s3627_s20 + $0x18] sm:$0xff]  ;;  %331 = vadd.xlane.f32.xlu0 %v330_v3  ;;  %v333_v10 = vadd.f32 %v3643_v6, %v3640_v5  ;;  %5382 = vst [vmem:[#allocation6_spill] sm:$0xff] %v3650_v12  ;;  %v3653_v13 = vld [vmem:[%s3627_s20 + $0x128] sm:$0xff]  ;;  %v461_v24 = vmax.f32 %v3640_v5, %v3643_v6 }
  0x16   : > { %283 = vadd.xlane.f32.xlu1 %v282_v7  ;;  %v285_v11 = vadd.f32 %v221_v9, %v220_v8  ;;  %5383 = vst [vmem:[#allocation7_spill] sm:$0xff] %v3653_v13  ;;  %v222_v14 = vld [vmem:[%s3627_s20 + $0x20] sm:$0xff]  ;;  %v223_v15 = vld [vmem:[%s3627_s20 + $0x28] sm:$0xff]  ;;  %v336_v16 = vadd.f32 %v3653_v13, %v3650_v12  ;;  %v3660_v18 = vld [vmem:[%s3627_s20 + $0x130] sm:$0xff]  ;;  %v413_v30 = vmax.f32 %v220_v8, %v221_v9 }
  0x17   : > { %v288_v17 = vadd.f32 %v223_v15, %v222_v14  ;;  %5384 = vst [vmem:[#allocation8_spill] sm:$0xff] %v3660_v18  ;;  %v3663_v19 = vld [vmem:[%s3627_s20 + $0x138] sm:$0xff]  ;;  %v3670_v22 = vld [vmem:[%s3627_s20 + $0x30] sm:$0xff]  ;;  %v3680_v26 = vld [vmem:[%s3627_s20 + $0x140] sm:$0xff]  ;;  %v464_v31 = vmax.f32 %v3650_v12, %v3653_v13  ;;  %v416_v38 = vmax.f32 %v222_v14, %v223_v15 }
  0x18   : > { %5385 = vst [vmem:[#allocation9_spill] sm:$0xff] %v3663_v19  ;;  %v339_v20 = vadd.f32 %v3663_v19, %v3660_v18  ;;  %5386 = vst [vmem:[#allocation10_spill] sm:$0xff] %v3670_v22  ;;  %v3673_v23 = vld [vmem:[%s3627_s20 + $0x38] sm:$0xff]  ;;  %v3683_v27 = vld [vmem:[%s3627_s20 + $0x148] sm:$0xff]  ;;  %v467_v39 = vmax.f32 %v3660_v18, %v3663_v19 }
  0x19   : > { %334 = vadd.xlane.f32.xlu0 %v333_v10  ;;  %5387 = vst [vmem:[#allocation11_spill] sm:$0xff] %v3673_v23  ;;  %v291_v25 = vadd.f32 %v3673_v23, %v3670_v22  ;;  %5388 = vst [vmem:[#allocation12_spill] sm:$0xff] %v3680_v26  ;;  %v342_v28 = vadd.f32 %v3683_v27, %v3680_v26  ;;  %v226_v32 = vld [vmem:[%s3627_s20 + $0x40] sm:$0xff]  ;;  %v227_v33 = vld [vmem:[%s3627_s20 + $0x48] sm:$0xff]  ;;  %v419_v46 = vmax.f32 %v3670_v22, %v3673_v23 }
  0x1a   : > { %286 = vadd.xlane.f32.xlu1 %v285_v11  ;;  %5389 = vst [vmem:[#allocation13_spill] sm:$0xff] %v3683_v27  ;;  %v3692_v34 = vld [vmem:[%s3627_s20 + $0x150] sm:$0xff]  ;;  %v3695_v35 = vld [vmem:[%s3627_s20 + $0x158] sm:$0xff]  ;;  %v294_v36 = vadd.f32 %v227_v33, %v226_v32  ;;  %v3708_v42 = vld [vmem:[%s3627_s20 + $0x160] sm:$0xff]  ;;  %v470_v47 = vmax.f32 %v3680_v26, %v3683_v27  ;;  %v422_v54 = vmax.f32 %v226_v32, %v227_v33 }
  0x1b   : > { %5390 = vst [vmem:[#allocation14_spill] sm:$0xff] %v3692_v34  ;;  %5391 = vst [vmem:[#allocation15_spill] sm:$0xff] %v3695_v35  ;;  %v345_v37 = vadd.f32 %v3695_v35, %v3692_v34  ;;  %v3702_v40 = vld [vmem:[%s3627_s20 + $0x50] sm:$0xff]  ;;  %v3705_v41 = vld [vmem:[%s3627_s20 + $0x58] sm:$0xff]  ;;  %v473_v55 = vmax.f32 %v3692_v34, %v3695_v35 }
  0x1c   : > { %5392 = vst [vmem:[#allocation16_spill] sm:$0xff] %v3702_v40  ;;  %5393 = vst [vmem:[#allocation17_spill] sm:$0xff] %v3705_v41  ;;  %v3711_v43 = vld [vmem:[%s3627_s20 + $0x168] sm:$0xff]  ;;  %v297_v44 = vadd.f32 %v3705_v41, %v3702_v40  ;;  %v3722_v48 = vld [vmem:[%s3627_s20 + $0x60] sm:$0xff]  ;;  %v425_v62 = vmax.f32 %v3702_v40, %v3705_v41 }
  0x1d   : > { %337 = vadd.xlane.f32.xlu0 %v336_v16  ;;  %5394 = vst [vmem:[#allocation18_spill] sm:$0xff] %v3708_v42  ;;  %5395 = vst [vmem:[#allocation19_spill] sm:$0xff] %v3711_v43  ;;  %v348_v45 = vadd.f32 %v3711_v43, %v3708_v42  ;;  %v3725_v49 = vld [vmem:[%s3627_s20 + $0x68] sm:$0xff]  ;;  %v3728_v50 = vld [vmem:[%s3627_s20 + $0x170] sm:$0xff]  ;;  %v476_v63 = vmax.f32 %v3708_v42, %v3711_v43 }
  0x1e   : > { %289 = vadd.xlane.f32.xlu1 %v288_v17  ;;  %5396 = vst [vmem:[#allocation20_spill] sm:$0xff] %v3722_v48  ;;  %5397 = vst [vmem:[#allocation21_spill] sm:$0xff] %v3725_v49  ;;  %v3731_v51 = vld [vmem:[%s3627_s20 + $0x178] sm:$0xff]  ;;  %v300_v52 = vadd.f32 %v3725_v49, %v3722_v48  ;;  %v3740_v56 = vld [vmem:[%s3627_s20 + $0x70] sm:$0xff]  ;;  %v428_v10 = vmax.f32 %v3722_v48, %v3725_v49 }
  0x1f   : > { %5398 = vst [vmem:[#allocation22_spill] sm:$0xff] %v3728_v50  ;;  %5399 = vst [vmem:[#allocation23_spill] sm:$0xff] %v3731_v51  ;;  %v351_v53 = vadd.f32 %v3731_v51, %v3728_v50  ;;  %v3743_v57 = vld [vmem:[%s3627_s20 + $0x78] sm:$0xff]  ;;  %v3746_v58 = vld [vmem:[%s3627_s20 + $0x180] sm:$0xff]  ;;  %v479_v11 = vmax.f32 %v3728_v50, %v3731_v51 }
  0x20   : > { %5400 = vst [vmem:[#allocation24_spill] sm:$0xff] %v3740_v56  ;;  %5401 = vst [vmem:[#allocation25_spill] sm:$0xff] %v3743_v57  ;;  %v3749_v59 = vld [vmem:[%s3627_s20 + $0x188] sm:$0xff]  ;;  %v303_v60 = vadd.f32 %v3743_v57, %v3740_v56  ;;  %v3760_v2 = vld [vmem:[%s3627_s20 + $0x80] sm:$0xff] }
  0x21   : > { %340 = vadd.xlane.f32.xlu0 %v339_v20  ;;  %5402 = vst [vmem:[#allocation26_spill] sm:$0xff] %v3746_v58  ;;  %5403 = vst [vmem:[#allocation27_spill] sm:$0xff] %v3749_v59  ;;  %v354_v61 = vadd.f32 %v3749_v59, %v3746_v58  ;;  %v3763_v3 = vld [vmem:[%s3627_s20 + $0x88] sm:$0xff]  ;;  %v3766_v4 = vld [vmem:[%s3627_s20 + $0x190] sm:$0xff] }
  0x22   : > { %459 = vmax.xlane.f32.xlu1 %v458_v21  ;;  %5404 = vst [vmem:[#allocation28_spill] sm:$0xff] %v3760_v2  ;;  %5405 = vst [vmem:[#allocation29_spill] sm:$0xff] %v3763_v3  ;;  %v3769_v7 = vld [vmem:[%s3627_s20 + $0x198] sm:$0xff]  ;;  %v306_v8 = vadd.f32 %v3763_v3, %v3760_v2  ;;  %v3780_v14 = vld [vmem:[%s3627_s20 + $0x90] sm:$0xff] }
  0x23   : > { %5406 = vst [vmem:[#allocation30_spill] sm:$0xff] %v3766_v4  ;;  %5407 = vst [vmem:[#allocation31_spill] sm:$0xff] %v3769_v7  ;;  %v357_v9 = vadd.f32 %v3769_v7, %v3766_v4  ;;  %v3783_v15 = vld [vmem:[%s3627_s20 + $0x98] sm:$0xff]  ;;  %v3786_v16 = vld [vmem:[%s3627_s20 + $0x1a0] sm:$0xff] }
  0x24   : > { %5408 = vst [vmem:[#allocation32_spill] sm:$0xff] %v3780_v14  ;;  %5409 = vst [vmem:[#allocation33_spill] sm:$0xff] %v3783_v15  ;;  %v3789_v17 = vld [vmem:[%s3627_s20 + $0x1a8] sm:$0xff]  ;;  %v309_v20 = vadd.f32 %v3783_v15, %v3780_v14  ;;  %v945_v42 = vld [vmem:[%s5216_s2 + $0xa0] sm:$0xff] }
  0x25   : > { %462 = vmax.xlane.f32.xlu0 %v461_v24  ;;  %5410 = vst [vmem:[#allocation34_spill] sm:$0xff] %v3786_v16  ;;  %5411 = vst [vmem:[#allocation35_spill] sm:$0xff] %v3789_v17  ;;  %v360_v21 = vadd.f32 %v3789_v17, %v3786_v16  ;;  %v431_v24 = vmax.f32 %v3740_v56, %v3743_v57  ;;  %v947_v12 = vld [vmem:[%s5216_s2 + $0xb0] sm:$0xff]  ;;  %v949_v1 = vld [vmem:[%s5216_s2 + $0xc0] sm:$0xff] }
  0x26   : > { %292 = vadd.xlane.f32.xlu1 %v291_v25  ;;  %v482_v25 = vmax.f32 %v3746_v58, %v3749_v59 }
  0x29   : > { %343 = vadd.xlane.f32.xlu0 %v342_v28  ;;  %v3800_v28 = vld [vmem:[%s3627_s20 + $0xa0] sm:$0xff] }
  0x2a   : > { %411 = vmax.xlane.f32.xlu1 %v410_v29  ;;  %5412 = vst [vmem:[#allocation36_spill] sm:$0xff] %v3800_v28  ;;  %v3803_v29 = vld [vmem:[%s3627_s20 + $0xa8] sm:$0xff] }
  0x2b   : > { %5413 = vst [vmem:[#allocation37_spill] sm:$0xff] %v3803_v29  ;;  %v312_v32 = vadd.f32 %v3803_v29, %v3800_v28 }
  0x2d   : > { %414 = vmax.xlane.f32.xlu0 %v413_v30  ;;  %v3806_v30 = vld [vmem:[%s3627_s20 + $0x1b0] sm:$0xff] }
  0x2e   : > { %465 = vmax.xlane.f32.xlu1 %v464_v31  ;;  %5414 = vst [vmem:[#allocation38_spill] sm:$0xff] %v3806_v30  ;;  %v3809_v31 = vld [vmem:[%s3627_s20 + $0x1b8] sm:$0xff] }
  0x2f   : > { %5415 = vst [vmem:[#allocation39_spill] sm:$0xff] %v3809_v31  ;;  %v363_v33 = vadd.f32 %v3809_v31, %v3806_v30 }
  0x31   : > { %295 = vadd.xlane.f32.xlu0 %v294_v36  ;;  %v434_v36 = vmax.f32 %v3760_v2, %v3763_v3 }
  0x32   : > { %346 = vadd.xlane.f32.xlu1 %v345_v37  ;;  %v485_v37 = vmax.f32 %v3766_v4, %v3769_v7  ;;  %v943_v4 = vld [vmem:[%s5216_s2 + $0x90] sm:$0xff] }
  0x35   : > { %417 = vmax.xlane.f32.xlu0 %v416_v38  ;;  %v3820_v38 = vld [vmem:[%s3627_s20 + $0xb0] sm:$0xff] }
  0x36   : > { %468 = vmax.xlane.f32.xlu1 %v467_v39  ;;  %5416 = vst [vmem:[#allocation40_spill] sm:$0xff] %v3820_v38  ;;  %v3823_v39 = vld [vmem:[%s3627_s20 + $0xb8] sm:$0xff] }
  0x37   : > { %5417 = vst [vmem:[#allocation41_spill] sm:$0xff] %v3823_v39 }
  0x39   : > { %298 = vadd.xlane.f32.xlu0 %v297_v44  ;;  %v3826_v44 = vld [vmem:[%s3627_s20 + $0x1c0] sm:$0xff] }
  0x3a   : > { %349 = vadd.xlane.f32.xlu1 %v348_v45  ;;  %5418 = vst [vmem:[#allocation42_spill] sm:$0xff] %v3826_v44  ;;  %v3829_v45 = vld [vmem:[%s3627_s20 + $0x1c8] sm:$0xff] }
  0x3b   : > { %5419 = vst [vmem:[#allocation43_spill] sm:$0xff] %v3829_v45 }
  0x3d   : > { %420 = vmax.xlane.f32.xlu0 %v419_v46  ;;  %v315_v46 = vadd.f32 %v3823_v39, %v3820_v38 }
  0x3e   : > { %471 = vmax.xlane.f32.xlu1 %v470_v47  ;;  %v366_v47 = vadd.f32 %v3829_v45, %v3826_v44 }
  0x41   : > { %301 = vadd.xlane.f32.xlu0 %v300_v52  ;;  %v437_v52 = vmax.f32 %v3780_v14, %v3783_v15 }
  0x42   : > { %352 = vadd.xlane.f32.xlu1 %v351_v53  ;;  %v488_v53 = vmax.f32 %v3786_v16, %v3789_v17  ;;  %v944_v17 = vld [vmem:[%s5216_s2 + $0x98] sm:$0xff] }
  0x43   : > { %v928_v16 = vld [vmem:[%s5216_s2 + $0x18] sm:$0xff] }
  0x44   : > { %v967_v50 = vand.u32 4294901760, %v928_v16 }
  0x45   : > { %423 = vmax.xlane.f32.xlu0 %v422_v54  ;;  %v3840_v54 = vld [vmem:[%s3627_s20 + $0xc0] sm:$0xff] }
  0x46   : > { %474 = vmax.xlane.f32.xlu1 %v473_v55  ;;  %5420 = vst [vmem:[#allocation44_spill] sm:$0xff] %v3840_v54  ;;  %v3843_v55 = vld [vmem:[%s3627_s20 + $0xc8] sm:$0xff]  ;;  %v3953_v43 = vsub.f32 %v928_v16, %v967_v50  ;;  %v929_v16 = vld [vmem:[%s5216_s2 + $0x20] sm:$0xff] }
  0x47   : > { %5421 = vst [vmem:[#allocation45_spill] sm:$0xff] %v3843_v55 }
  0x49   : > { %304 = vadd.xlane.f32.xlu0 %v303_v60  ;;  %v3846_v60 = vld [vmem:[%s3627_s20 + $0x1d0] sm:$0xff] }
  0x4a   : > { %355 = vadd.xlane.f32.xlu1 %v354_v61  ;;  %5422 = vst [vmem:[#allocation46_spill] sm:$0xff] %v3846_v60  ;;  %v3849_v61 = vld [vmem:[%s3627_s20 + $0x1d8] sm:$0xff] }
  0x4b   : > { %5423 = vst [vmem:[#allocation47_spill] sm:$0xff] %v3849_v61 }
  0x4d   : > { %426 = vmax.xlane.f32.xlu0 %v425_v62  ;;  %v318_v62 = vadd.f32 %v3843_v55, %v3840_v54 }
  0x4e   : > { %477 = vmax.xlane.f32.xlu1 %v476_v63  ;;  %v369_v63 = vadd.f32 %v3849_v61, %v3846_v60 }
  0x51   : > { %307 = vadd.xlane.f32.xlu0 %v306_v8  ;;  %v440_v8 = vmax.f32 %v3800_v28, %v3803_v29 }
  0x52   : > { %358 = vadd.xlane.f32.xlu1 %v357_v9  ;;  %v491_v9 = vmax.f32 %v3806_v30, %v3809_v31  ;;  %v926_v31 = vld [vmem:[%s5216_s2 + $0x8] sm:$0xff] }
  0x55   : > { %429 = vmax.xlane.f32.xlu0 %v428_v10  ;;  %v3860_v10 = vld [vmem:[%s3627_s20 + $0xd0] sm:$0xff] }
  0x56   : > { %480 = vmax.xlane.f32.xlu1 %v479_v11  ;;  %5424 = vst [vmem:[#allocation48_spill] sm:$0xff] %v3860_v10  ;;  %v3863_v11 = vld [vmem:[%s3627_s20 + $0xd8] sm:$0xff] }
  0x57   : > { %5425 = vst [vmem:[#allocation49_spill] sm:$0xff] %v3863_v11 }
  0x59   : > { %310 = vadd.xlane.f32.xlu0 %v309_v20  ;;  %v3866_v20 = vld [vmem:[%s3627_s20 + $0x1e0] sm:$0xff] }
  0x5a   : > { %361 = vadd.xlane.f32.xlu1 %v360_v21  ;;  %5426 = vst [vmem:[#allocation50_spill] sm:$0xff] %v3866_v20  ;;  %v3869_v21 = vld [vmem:[%s3627_s20 + $0x1e8] sm:$0xff] }
  0x5b   : > { %5427 = vst [vmem:[#allocation51_spill] sm:$0xff] %v3869_v21  ;;  %v500_v35 = vmax.f32 %v3866_v20, %v3869_v21 }
  0x5d   : > { %432 = vmax.xlane.f32.xlu0 %v431_v24  ;;  %v321_v24 = vadd.f32 %v3863_v11, %v3860_v10 }
  0x5e   : > { %483 = vmax.xlane.f32.xlu1 %v482_v25  ;;  %v372_v25 = vadd.f32 %v3869_v21, %v3866_v20 }
  0x61   : > { %313 = vadd.xlane.f32.xlu0 %v312_v32  ;;  %v443_v32 = vmax.f32 %v3820_v38, %v3823_v39 }
  0x62   : > { %364 = vadd.xlane.f32.xlu1 %v363_v33  ;;  %v494_v33 = vmax.f32 %v3826_v44, %v3829_v45  ;;  %v961_v45 = vand.u32 4294901760, %v926_v31 }
  0x64   : > { %v3925_v7 = vsub.f32 %v926_v31, %v961_v45  ;;  %v927_v31 = vld [vmem:[%s5216_s2 + $0x10] sm:$0xff] }
  0x65   : > { %435 = vmax.xlane.f32.xlu0 %v434_v36  ;;  %v3880_v36 = vld [vmem:[%s3627_s20 + $0xe0] sm:$0xff] }
  0x66   : > { %486 = vmax.xlane.f32.xlu1 %v485_v37  ;;  %5428 = vst [vmem:[#allocation52_spill] sm:$0xff] %v3880_v36  ;;  %v3883_v37 = vld [vmem:[%s3627_s20 + $0xe8] sm:$0xff] }
  0x67   : > { %5429 = vst [vmem:[#allocation53_spill] sm:$0xff] %v3883_v37 }
  0x69   : > { %316 = vadd.xlane.f32.xlu0 %v315_v46  ;;  %v3886_v46 = vld [vmem:[%s3627_s20 + $0x1f0] sm:$0xff] }
  0x6a   : > { %367 = vadd.xlane.f32.xlu1 %v366_v47  ;;  %5430 = vst [vmem:[#allocation54_spill] sm:$0xff] %v3886_v46  ;;  %v3889_v47 = vld [vmem:[%s3627_s20 + $0x1f8] sm:$0xff] }
  0x6b   : > { %5431 = vst [vmem:[#allocation55_spill] sm:$0xff] %v3889_v47  ;;  %v503_v19 = vmax.f32 %v3886_v46, %v3889_v47 }
  0x6d   : > { %438 = vmax.xlane.f32.xlu0 %v437_v52  ;;  %v324_v52 = vadd.f32 %v3883_v37, %v3880_v36 }
  0x6e   : > { %489 = vmax.xlane.f32.xlu1 %v488_v53  ;;  %v375_v53 = vadd.f32 %v3889_v47, %v3886_v46 }
  0x71   : > { %319 = vadd.xlane.f32.xlu0 %v318_v62  ;;  %v446_v62 = vmax.f32 %v3840_v54, %v3843_v55 }
  0x72   : > { %370 = vadd.xlane.f32.xlu1 %v369_v63  ;;  %v3898_v63 = vld [vmem:[%s3627_s20 + $0xf0] sm:$0xff] }
  0x73   : > { %5432 = vst [vmem:[#allocation56_spill] sm:$0xff] %v3898_v63 }
  0x75   : > { %441 = vmax.xlane.f32.xlu0 %v440_v8  ;;  %v941_v8 = vld [vmem:[%s5216_s2 + $0x80] sm:$0xff] }
  0x76   : > { %492 = vmax.xlane.f32.xlu1 %v491_v9  ;;  %v942_v9 = vld [vmem:[%s5216_s2 + $0x88] sm:$0xff] }
  0x79   : > { %322 = vadd.xlane.f32.xlu0 %v321_v24  ;;  %v497_v24 = vmax.f32 %v3846_v60, %v3849_v61 }
  0x7a   : > { %373 = vadd.xlane.f32.xlu1 %v372_v25  ;;  %v3909_v25 = vld [vmem:[%s3627_s20 + $0xf8] sm:$0xff] }
  0x7b   : > { %5433 = vst [vmem:[#allocation57_spill] sm:$0xff] %v3909_v25  ;;  %v327_v61 = vadd.f32 %v3909_v25, %v3898_v63 }
  0x7d   : > { %444 = vmax.xlane.f32.xlu0 %v443_v32  ;;  %v1006_v32 = vand.u32 4294901760, %v941_v8 }
  0x7e   : > { %495 = vmax.xlane.f32.xlu1 %v494_v33  ;;  %v1009_v33 = vand.u32 4294901760, %v942_v9 }
  0x7f   : > { %v3917_v44 = vsub.f32 %v941_v8, %v1006_v32  ;;  %v449_v8 = vmax.f32 %v3860_v10, %v3863_v11 }
  0x80   : > { %v3975_v18 = vpack.c.bf16 %v1009_v33, %v1006_v32  ;;  %v948_v32 = vld [vmem:[%s5216_s2 + $0xb8] sm:$0xff] }
  0x81   : > { %325 = vadd.xlane.f32.xlu0 %v324_v52  ;;  %v925_v52 = vld [vmem:[%s5216_s2] sm:$0xff] }
  0x82   : > { %376 = vadd.xlane.f32.xlu1 %v375_v53  ;;  %v958_v30 = vand.u32 4294901760, %v925_v52  ;;  %v3919_v53 = vsub.f32 %v942_v9, %v1009_v33  ;;  %v1012_v9 = vand.u32 4294901760, %v943_v4  ;;  %5434 = vst [vmem:[#allocation58_spill] sm:$0xff] %v3975_v18  ;;  %3257 = vmatprep.subr.bf16.mxu1 %v3975_v18  ;;  %v932_v33 = vld [vmem:[%s5216_s2 + $0x38] sm:$0xff] }
  0x84   : > { %v3923_v60 = vsub.f32 %v925_v52, %v958_v30  ;;  %v1015_v52 = vand.u32 4294901760, %v944_v17  ;;  %v3945_v59 = vsub.f32 %v943_v4, %v1012_v9  ;;  %v946_v4 = vld [vmem:[%s5216_s2 + $0xa8] sm:$0xff]  ;;  %v3981_v6 = vpack.c.bf16 %v961_v45, %v958_v30 }
  0x85   : > { %447 = vmax.xlane.f32.xlu0 %v446_v62  ;;  %v3320_v62 = vpack.c.bf16 %v3919_v53, %v3917_v44  ;;  %v1024_v30 = vand.u32 4294901760, %v947_v12  ;;  %v1027_v45 = vand.u32 4294901760, %v948_v32 }
  0x86   : > { %498 = vmax.xlane.f32.xlu1 %v497_v24  ;;  %v3322_v51 = vpack.c.bf16 %v3925_v7, %v3923_v60  ;;  %v964_v24 = vand.u32 4294901760, %v927_v31  ;;  %v3947_v58 = vsub.f32 %v944_v17, %v1015_v52  ;;  %v452_v17 = vmax.f32 %v3880_v36, %v3883_v37  ;;  %5435 = vst [vmem:[#allocation59_spill] sm:$0xff] %v3981_v6  ;;  %v4052_v36 = vld [vmem:[%s5216_s2 + $0xd0] sm:$0xff] }
  0x87   : > { %3321 = vmatprep.subr.bf16.mxu0 %v3320_v62  ;;  %v1021_v62 = vand.u32 4294901760, %v946_v4  ;;  %3259 = vmatpush3.bf16.msra.mxu1 %v3981_v6  ;;  %v4011_v47 = vsub.f32 %v948_v32, %v1027_v45  ;;  %v538_v32 = vlaneseq  ;;  %v4074_v38 = vpack.c.bf16 %v1027_v45, %v1024_v30 }
  0x88   : > { %3323 = vmatpush3.bf16.msra.mxu0 %v3322_v51  ;;  %v3951_v34 = vsub.f32 %v927_v31, %v964_v24  ;;  %v1018_v51 = vand.u32 4294901760, %v945_v42  ;;  %v930_v31 = vld [vmem:[%s5216_s2 + $0x28] sm:$0xff]  ;;  %v4013_v46 = vpack.c.bf16 %v967_v50, %v964_v24 }
  0x89   : > { %328 = vadd.xlane.f32.xlu0 %v327_v61  ;;  %v3324_v61 = vpack.c.bf16 %v3947_v58, %v3945_v59  ;;  %v973_v20 = vand.u32 4294901760, %v930_v31  ;;  %v3979_v26 = vsub.f32 %v946_v4, %v1021_v62  ;;  %v934_v24 = vld [vmem:[%s5216_s2 + $0x48] sm:$0xff]  ;;  %v4072_v39 = vshrl.u32 %v538_v32, 7  ;;  %5442 = vst [vmem:[#allocation66_spill] sm:$0xff] %v4074_v38 }
  0x8a   : > { %450 = vmax.xlane.f32.xlu1 %v449_v8  ;;  %v3326_v21 = vpack.c.bf16 %v3953_v43, %v3951_v34  ;;  %v970_v8 = vand.u32 4294901760, %v929_v16  ;;  %v3977_v27 = vsub.f32 %v945_v42, %v1018_v51  ;;  %v455_v42 = vmax.f32 %v3898_v63, %v3909_v25  ;;  %5437 = vst [vmem:[#allocation61_spill] sm:$0xff] %v4013_v46 }
  0x8b   : > { %3325 = vmatprep.subr.bf16.mxu0 %v3324_v61  ;;  %v3985_v13 = vsub.f32 %v930_v31, %v973_v20  ;;  %v979_v61 = vand.u32 4294901760, %v932_v33  ;;  %v4009_v31 = vsub.f32 %v947_v12, %v1024_v30  ;;  %5441 = vst [vmem:[#allocation65_spill] sm:$0xff] %v4072_v39 }
  0x8c   : > { %3327 = vmatpush3.bf16.msra.mxu0 %v3326_v21  ;;  %v3983_v5 = vsub.f32 %v929_v16, %v970_v8  ;;  %v931_v21 = vld [vmem:[%s5216_s2 + $0x30] sm:$0xff]  ;;  %v4007_v16 = vpack.c.bf16 %v1015_v52, %v1012_v9  ;;  %v950_v9 = vld [vmem:[%s5216_s2 + $0xc8] sm:$0xff]  ;;  %v933_v52 = vld [vmem:[%s5216_s2 + $0x40] sm:$0xff]  ;;  %v4043_v11 = vpack.c.bf16 %v973_v20, %v970_v8  ;;  %v1036_v20 = vand.u32 4294901760, %v4052_v36 }
  0x8d   : > { %501 = vmax.xlane.f32.xlu0 %v500_v35  ;;  %v3328_v35 = vpack.c.bf16 %v3979_v26, %v3977_v27  ;;  %v4017_v63 = vsub.f32 %v932_v33, %v979_v61  ;;  %v3332_v12 = vpack.c.bf16 %v4011_v47, %v4009_v31  ;;  %v1033_v50 = vand.u32 4294901760, %v950_v9  ;;  %v935_v8 = vld [vmem:[%s5216_s2 + $0x50] sm:$0xff] }
  0x8e   : > { %453 = vmax.xlane.f32.xlu1 %v452_v17  ;;  %v3330_v4 = vpack.c.bf16 %v3985_v13, %v3983_v5  ;;  %v976_v17 = vand.u32 4294901760, %v931_v21  ;;  %5436 = vst [vmem:[#allocation60_spill] sm:$0xff] %v4007_v16  ;;  %3261 = vmatprep.subr.bf16.mxu1 %v4007_v16  ;;  %v4037_v33 = vpack.c.bf16 %v1021_v62, %v1018_v51  ;;  %5439 = vst [vmem:[#allocation63_spill] sm:$0xff] %v4043_v11  ;;  %v952_v51 = vld [vmem:[%s5216_s2 + $0xd8] sm:$0xff] }
  0x8f   : > { %3329 = vmatprep.subr.bf16.mxu0 %v3328_v35  ;;  %3263 = vmatpush3.bf16.msra.mxu1 %v4013_v46  ;;  %v982_v35 = vand.u32 4294901760, %v933_v52  ;;  %v4041_v0 = vsub.f32 %v950_v9, %v1033_v50  ;;  %v1039_v62 = vand.u32 4294901760, %v952_v51  ;;  %v936_v9 = vld [vmem:[%s5216_s2 + $0x58] sm:$0xff]  ;;  %v4077_v55 = vsub.f32 %v4052_v36, %v1036_v20  ;;  %v954_v36 = vld [vmem:[%s5216_s2 + $0xe8] sm:$0xff] }
  0x90   : > { %3331 = vmatpush3.bf16.msra.mxu0 %v3330_v4  ;;  %v4015_v25 = vsub.f32 %v931_v21, %v976_v17  ;;  %v985_v21 = vand.u32 4294901760, %v934_v24  ;;  %5438 = vst [vmem:[#allocation62_spill] sm:$0xff] %v4037_v33  ;;  %3265 = vmatprep.subr.bf16.mxu1 %v4037_v33  ;;  %v4082_v14 = vpack.c.bf16 %v979_v61, %v976_v17  ;;  %v1045_v17 = vand.u32 4294901760, %v954_v36  ;;  %v937_v61 = vld [vmem:[%s5216_s2 + $0x60] sm:$0xff] }
  0x91   : > { %504 = vmax.xlane.f32.xlu0 %v503_v19  ;;  %v1030_v19 = vand.u32 4294901760, %v949_v1  ;;  %3333 = vmatprep.subr.bf16.mxu0 %v3332_v12  ;;  %v4045_v10 = vsub.f32 %v933_v52, %v982_v35  ;;  %v4067_v12 = vand.u32 127, %v538_v32  ;;  %v4079_v54 = vsub.f32 %v952_v51, %v1039_v62  ;;  %v953_v32 = vld [vmem:[%s5216_s2 + $0xe0] sm:$0xff]  ;;  %v938_v51 = vld [vmem:[%s5216_s2 + $0x68] sm:$0xff] }
  0x92   : > { %456 = vmax.xlane.f32.xlu1 %v455_v42  ;;  %v3334_v42 = vpack.c.bf16 %v4017_v63, %v4015_v25  ;;  %v4047_v37 = vsub.f32 %v934_v24, %v985_v21  ;;  %v988_v24 = vand.u32 4294901760, %v935_v8  ;;  %5443 = vst [vmem:[#allocation67_spill] sm:$0xff] %v4082_v14  ;;  %v1042_v45 = vand.u32 4294901760, %v953_v32 }
  0x93   : > { %v4039_v4 = vsub.f32 %v949_v1, %v1030_v19  ;;  %5440 = vst [vmem:[#allocation64_spill] sm:$0xff] %v4067_v12  ;;  %3267 = vmatpush3.bf16.msra.mxu1 %v4043_v11  ;;  %v544_v15 = vadd.s32 4294967288, %v4067_v12  ;;  %v3340_v30 = vpack.c.bf16 %v4079_v54, %v4077_v55  ;;  %v4110_v57 = vpack.c.bf16 %v1033_v50, %v1030_v19  ;;  %v956_v19 = vld [vmem:[%s5216_s2 + $0xf8] sm:$0xff] }
  0x94   : > { %3335 = vmatpush3.bf16.msra.mxu0 %v3334_v42  ;;  %v3338_v52 = vpack.c.bf16 %v4047_v37, %v4045_v10  ;;  %v991_v42 = vand.u32 4294901760, %v936_v9  ;;  %v4084_v29 = vsub.f32 %v935_v8, %v988_v24  ;;  %3269 = vmatprep.subr.bf16.mxu1 %v4074_v38  ;;  %v994_v8 = vand.u32 4294901760, %v937_v61 }
  0x95   : > { %v3336_v1 = vpack.c.bf16 %v4041_v0, %v4039_v4  ;;  %5444 = vst [vmem:[#allocation68_spill] sm:$0xff] %v4110_v57  ;;  %v4112_v56 = vsub.f32 %v953_v32, %v1042_v45  ;;  %v4114_v3 = vsub.f32 %v954_v36, %v1045_v17  ;;  %v4117_v2 = vsub.s32 %v544_v15, %v4072_v39  ;;  %v939_v32 = vld [vmem:[%s5216_s2 + $0x70] sm:$0xff]  ;;  %v940_v36 = vld [vmem:[%s5216_s2 + $0x78] sm:$0xff] }
  0x96   : > { %v4086_v28 = vsub.f32 %v936_v9, %v991_v42  ;;  %v997_v9 = vand.u32 4294901760, %v938_v51  ;;  %v4119_v41 = vpack.c.bf16 %v985_v21, %v982_v35  ;;  %v4121_v40 = vsub.f32 %v937_v61, %v994_v8 }
  0x97   : > { %3337 = vmatprep.subr.bf16.mxu0 %v3336_v1  ;;  %3271 = vmatpush3.bf16.msra.mxu1 %v4082_v14  ;;  %v551_v50 = vadd.s32 4294967280, %v4067_v12  ;;  %v3344_v15 = vpack.c.bf16 %v4114_v3, %v4112_v56  ;;  %v1051_v21 = vand.u32 4294901760, %v956_v19  ;;  %v558_v61 = vadd.s32 4294967272, %v4067_v12 }
  0x98   : > { %3339 = vmatpush3.bf16.msra.mxu0 %v3338_v52  ;;  %v3342_v1 = vpack.c.bf16 %v4086_v28, %v4084_v29  ;;  %v4108_v52 = vsub.s32 %v4067_v12, %v4072_v39  ;;  %5445 = vst [vmem:[#allocation69_spill] sm:$0xff] %v4119_v41  ;;  %v4123_v49 = vsub.f32 %v938_v51, %v997_v9  ;;  %v1003_v48 = vand.u32 4294901760, %v940_v36 }
  0x99   : > { %3341 = vmatprep.subr.bf16.mxu0 %v3340_v30  ;;  %v4128_v30 = vld [vmem:[%s5216_s2 + $0xf0] sm:$0xff]  ;;  %3273 = vmatprep.subr.bf16.mxu1 %v4110_v57  ;;  %v565_v23 = vadd.s32 4294967264, %v4067_v12  ;;  %v4149_v22 = vpack.c.bf16 %v1039_v62, %v1036_v20  ;;  %v4154_v14 = vsub.f32 %v956_v19, %v1051_v21  ;;  %v572_v38 = vadd.s32 4294967256, %v4067_v12 }
  0x9a   : > { %v1048_v35 = vand.u32 4294901760, %v4128_v30  ;;  %v3346_v51 = vpack.c.bf16 %v4123_v49, %v4121_v40  ;;  %v4161_v33 = vsub.f32 %v940_v36, %v1003_v48  ;;  %v579_v16 = vadd.s32 4294967248, %v4067_v12 }
  0x9b   : > { %3275 = vmatpush3.bf16.msra.mxu1 %v4119_v41  ;;  %5446 = vst [vmem:[#allocation70_spill] sm:$0xff] %v4149_v22  ;;  %v4157_v41 = vpack.c.bf16 %v991_v42, %v988_v24  ;;  %v586_v20 = vadd.s32 4294967240, %v4067_v12  ;;  %v4171_v24 = vsub.s32 %v551_v50, %v4072_v39  ;;  %v4185_v50 = vsub.s32 %v565_v23, %v4072_v39 }
  0x9c   : > { %3343 = vmatpush3.bf16.msra.mxu0 %v3342_v1  ;;  %v1000_v1 = vand.u32 4294901760, %v939_v32  ;;  %v4152_v57 = vsub.f32 %v4128_v30, %v1048_v35  ;;  %5448 = vst [vmem:[#allocation72_spill] sm:$0xff] %v4161_v33  ;;  %3277 = vmatprep.subr.bf16.mxu1 %v4149_v22  ;;  %v4168_v30 = vpack.c.bf16 %v1045_v17, %v1042_v45  ;;  %v1184_v45 = vand.u32 4294901760, %v3917_v44 }
  0x9d   : > { %3345 = vmatprep.subr.bf16.mxu0 %v3344_v15  ;;  %5447 = vst [vmem:[#allocation71_spill] sm:$0xff] %v4157_v41  ;;  %v4182_v17 = vsub.s32 %v558_v61, %v4072_v39 }
  0x9e   : > { %v4159_v11 = vsub.f32 %v939_v32, %v1000_v1  ;;  %v3348_v62 = vpack.c.bf16 %v4154_v14, %v4152_v57  ;;  %5449 = vst [vmem:[#allocation73_spill] sm:$0xff] %v4168_v30  ;;  %v4176_v32 = vpack.c.bf16 %v997_v9, %v994_v8  ;;  %v1079_v8 = vand.u32 4294901760, %v3925_v7 }
  0x9f   : > { %3279 = vmatpush3.bf16.msra.mxu1 %v4157_v41 }
  0xa0   : > { %3347 = vmatpush3.bf16.msra.mxu0 %v3346_v51  ;;  %v3350_v42 = vpack.c.bf16 %v4161_v33, %v4159_v11  ;;  %5450 = vst [vmem:[#allocation74_spill] sm:$0xff] %v4176_v32  ;;  %3281 = vmatprep.subr.bf16.mxu1 %v4168_v30  ;;  %v1072_v51 = vand.u32 4294901760, %v3923_v60  ;;  %v4196_v30 = vsub.s32 %v586_v20, %v4072_v39  ;;  %v1205_v20 = vand.u32 4294901760, %v3947_v58 }
  0xa1   : > { %3349 = vmatprep.subr.bf16.mxu0 %v3348_v62  ;;  %v4190_v62 = vsub.s32 %v572_v38, %v4072_v39  ;;  %v4203_v38 = vpack.c.bf16 %v1051_v21, %v1048_v35  ;;  %v1185_v35 = vsub.f32 %v3917_v44, %v1184_v45 }
  0xa2   : > { %v332_v46 = vpop.xlane.xlu0 %331  ;;  %5451 = vst [vmem:[#allocation75_spill] sm:$0xff] %v4196_v30  ;;  %v4201_v6 = vpack.c.bf16 %v1079_v8, %v1072_v51  ;;  %v1073_v12 = vsub.f32 %v3923_v60, %v1072_v51  ;;  %v1100_v60 = vand.u32 4294901760, %v3983_v5 }
  0xa3   : > { %v394_v19 = vmul.f32 0.00390625, %v332_v46  ;;  %v284_v15 = vpop.xlane.xlu1 %283  ;;  %v1191_v46 = vand.u32 4294901760, %v3919_v53  ;;  %3283 = vmatpush3.bf16.msra.mxu1 %v4176_v32  ;;  %5453 = vst [vmem:[#allocation77_spill] sm:$0xff] %v4203_v38 }
  0xa4   : > { %v378_v36 = vmul.f32 0.00390625, %v284_v15  ;;  %3351 = vmatpush3.bf16.msra.mxu0 %v3350_v42  ;;  %v4193_v15 = vsub.s32 %v579_v16, %v4072_v39  ;;  %5452 = vst [vmem:[#allocation76_spill] sm:$0xff] %v4201_v6  ;;  %v1198_v16 = vand.u32 4294901760, %v3945_v59  ;;  %3285 = vmatprep.subr.bf16.mxu1 %v4203_v38  ;;  %v1186_v38 = vand.u32 4294901760, %v1185_v35 }
  0xa5   : > { %v3384_v61 = vpack.c.bf16 %v1191_v46, %v1184_v45  ;;  %v652_v41 = vrot.slane %v394_v19, %v4108_v52  ;;  %v4208_v19 = vpack.c.bf16 %v1003_v48, %v1000_v1  ;;  %v1192_v21 = vsub.f32 %v3919_v53, %v1191_v46 }
  0xa6   : > { %v335_v9 = vpop.xlane.xlu0 %334  ;;  %v543_v23 = vrot.slane %v378_v36, %v4108_v52  ;;  %v1086_v36 = vand.u32 4294901760, %v3951_v34  ;;  %v1074_v44 = vand.u32 4294901760, %v1073_v12  ;;  %v1080_v53 = vsub.f32 %v3925_v7, %v1079_v8 }
  0xa7   : > { %v395_v42 = vmul.f32 0.00390625, %v335_v9  ;;  %v287_v22 = vpop.xlane.xlu1 %286  ;;  %3385 = vmatprep.subr.bf16.mxu0 %v3384_v61  ;;  %5454 = vst [vmem:[#allocation78_spill] sm:$0xff] %v4208_v19  ;;  %v1093_v9 = vand.u32 4294901760, %v3953_v43  ;;  %3287 = vmatpush3.bf16.msra.mxu1 %v4208_v19  ;;  %v1193_v33 = vand.u32 4294901760, %v1192_v21  ;;  %v1219_v46 = vand.u32 4294901760, %v3979_v26 }
  0xa8   : > { %v379_v18 = vmul.f32 0.00390625, %v287_v22  ;;  %v4214_v22 = vpack.c.bf16 %v1205_v20, %v1198_v16  ;;  %v1081_v35 = vand.u32 4294901760, %v1080_v53  ;;  %v1107_v21 = vand.u32 4294901760, %v3985_v13 }
  0xa9   : > { %v656_v39 = vrot.slane %v395_v42, %v4117_v2  ;;  %v4220_v1 = vpack.c.bf16 %v1093_v9, %v1086_v36  ;;  %v3288_v45 = vpack.c.bf16 %v1193_v33, %v1186_v38  ;;  %v1199_v33 = vsub.f32 %v3945_v59, %v1198_v16 }
  0xaa   : > { %v548_v32 = vrot.slane %v379_v18, %v4117_v2  ;;  %v338_v6 = vpop.xlane.xlu0 %337  ;;  %5455 = vst [vmem:[#allocation79_spill] sm:$0xff] %v4214_v22  ;;  %v4238_v38 = vpack.c.bf16 %v1081_v35, %v1074_v44  ;;  %v1094_v53 = vsub.f32 %v3953_v43, %v1093_v9  ;;  %v1233_v44 = vand.u32 4294901760, %v4011_v47 }
  0xab   : > { %v657_v61 = vsel %vm549_vm0, %v656_v39, %v652_v41  ;;  %v396_v42 = vmul.f32 0.00390625, %v338_v6  ;;  %v290_v48 = vpop.xlane.xlu1 %289  ;;  %v1212_v41 = vand.u32 4294901760, %v3977_v27  ;;  %3289 = vmatprep.subr.bf16.mxu1 %v3288_v45 }
  0xac   : > { %v550_v18 = vsel %vm549_vm0, %v548_v32, %v543_v23  ;;  %v380_v30 = vmul.f32 0.00390625, %v290_v48  ;;  %v1200_v48 = vand.u32 4294901760, %v1199_v33  ;;  %v1095_v35 = vand.u32 4294901760, %v1094_v53 }
  0xad   : > { %v661_v22 = vrot.slane %v396_v42, %v4171_v24 }
  0xae   : > { %v555_v6 = vrot.slane %v380_v30, %v4171_v24  ;;  %v341_v39 = vpop.xlane.xlu0 %340  ;;  %v4234_v30 = vpack.c.bf16 %v1219_v46, %v1212_v41 }
  0xaf   : > { %v662_v32 = vsel %vm556_vm1, %v661_v22, %v657_v61  ;;  %v397_v51 = vmul.f32 0.00390625, %v341_v39  ;;  %v460_v23 = vpop.xlane.xlu1 %459  ;;  %v4240_v22 = vpack.c.bf16 %v1107_v21, %v1100_v60  ;;  %v1206_v61 = vsub.f32 %v3947_v58, %v1205_v20 }
  0xb0   : > { %v557_v12 = vsel %vm556_vm1, %v555_v6, %v550_v18  ;;  %v844_v7 = vrot.slane %v460_v23, %v4108_v52  ;;  %v1087_v18 = vsub.f32 %v3951_v34, %v1086_v36  ;;  %v1226_v6 = vand.u32 4294901760, %v4009_v31 }
  0xb1   : > { %v666_v8 = vrot.slane %v397_v51, %v4182_v17  ;;  %v1207_v45 = vand.u32 4294901760, %v1206_v61  ;;  %v1114_v58 = vand.u32 4294901760, %v4015_v25  ;;  %v1121_v36 = vand.u32 4294901760, %v4017_v63 }
  0xb2   : > { %v463_v42 = vpop.xlane.xlu0 %462  ;;  %v1088_v23 = vand.u32 4294901760, %v1087_v18  ;;  %v4253_v43 = vpack.c.bf16 %v1233_v44, %v1226_v6  ;;  %v1220_v61 = vsub.f32 %v3979_v26, %v1219_v46  ;;  %v1240_v26 = vand.u32 4294901760, %v4039_v4 }
  0xb3   : > { %v667_v39 = vsel %vm563_vm2, %v666_v8, %v662_v32  ;;  %v848_v59 = vrot.slane %v463_v42, %v4117_v2  ;;  %v293_v16 = vpop.xlane.xlu1 %292  ;;  %v4251_v34 = vpack.c.bf16 %v1207_v45, %v1200_v48  ;;  %v1213_v8 = vsub.f32 %v3977_v27, %v1212_v41 }
  0xb4   : > { %v381_v51 = vmul.f32 0.00390625, %v293_v16  ;;  %v4257_v33 = vpack.c.bf16 %v1095_v35, %v1088_v23  ;;  %v4261_v53 = vpack.c.bf16 %v1121_v36, %v1114_v58  ;;  %v1108_v48 = vsub.f32 %v3985_v13, %v1107_v21 }
  0xb5   : > { %v849_v20 = vsel %vm549_vm0, %v848_v59, %v844_v7  ;;  %v1101_v7 = vsub.f32 %v3983_v5, %v1100_v60  ;;  %v1214_v45 = vand.u32 4294901760, %v1213_v8  ;;  %v1247_v5 = vand.u32 4294901760, %v4041_v0 }
  0xb6   : > { %v562_v9 = vrot.slane %v381_v51, %v4182_v17  ;;  %v344_v32 = vpop.xlane.xlu0 %343  ;;  %v1221_v51 = vand.u32 4294901760, %v1220_v61  ;;  %v1109_v41 = vand.u32 4294901760, %v1108_v48  ;;  %v1128_v13 = vand.u32 4294901760, %v4045_v10 }
  0xb7   : > { %v398_v42 = vmul.f32 0.00390625, %v344_v32  ;;  %v412_v18 = vpop.xlane.xlu1 %411  ;;  %v1102_v27 = vand.u32 4294901760, %v1101_v7  ;;  %v1135_v60 = vand.u32 4294901760, %v4047_v37  ;;  %v1227_v32 = vsub.f32 %v4009_v31, %v1226_v6 }
  0xb8   : > { %v564_v59 = vsel %vm563_vm2, %v562_v9, %v557_v12  ;;  %v765_v16 = vrot.slane %v412_v18, %v4108_v52  ;;  %v4269_v35 = vpack.c.bf16 %v1221_v51, %v1214_v45  ;;  %v4280_v61 = vpack.c.bf16 %v1247_v5, %v1240_v26 }
  0xb9   : > { %v671_v23 = vrot.slane %v398_v42, %v4185_v50  ;;  %v4276_v9 = vpack.c.bf16 %v1109_v41, %v1102_v27  ;;  %v4282_v42 = vpack.c.bf16 %v1135_v60, %v1128_v13  ;;  %v1234_v18 = vsub.f32 %v4011_v47, %v1233_v44 }
  0xba   : > { %v415_v46 = vpop.xlane.xlu0 %414  ;;  %v1228_v48 = vand.u32 4294901760, %v1227_v32  ;;  %v1254_v31 = vand.u32 4294901760, %v4077_v55  ;;  %v1261_v6 = vand.u32 4294901760, %v4079_v54  ;;  %v1142_v47 = vand.u32 4294901760, %v4084_v29 }
  0xbb   : > { %v672_v52 = vsel %vm570_vm3, %v671_v23, %v667_v39  ;;  %v769_v21 = vrot.slane %v415_v46, %v4117_v2  ;;  %v466_v12 = vpop.xlane.xlu1 %465  ;;  %5456 = vst [vmem:[#allocation80_spill] sm:$0xff] %v4282_v42  ;;  %v1115_v39 = vsub.f32 %v4015_v25, %v1114_v58  ;;  %v1122_v2 = vsub.f32 %v4017_v63, %v1121_v36 }
  0xbc   : > { %v853_v8 = vrot.slane %v466_v12, %v4171_v24  ;;  %v1235_v23 = vand.u32 4294901760, %v1234_v18  ;;  %v4294_v25 = vpack.c.bf16 %v1261_v6, %v1254_v31  ;;  %v1149_v63 = vand.u32 4294901760, %v4086_v28 }
  0xbd   : > { %v770_v7 = vsel %vm549_vm0, %v769_v21, %v765_v16  ;;  %v1116_v46 = vand.u32 4294901760, %v1115_v39  ;;  %v1123_v12 = vand.u32 4294901760, %v1122_v2  ;;  %v1241_v36 = vsub.f32 %v4039_v4, %v1240_v26 }
  0xbe   : > { %v854_v45 = vsel %vm556_vm1, %v853_v8, %v849_v20  ;;  %v296_v51 = vpop.xlane.xlu0 %295  ;;  %v4292_v16 = vpack.c.bf16 %v1235_v23, %v1228_v48  ;;  %5458 = vst [vmem:[#allocation82_spill] sm:$0xff] %v4294_v25  ;;  %v1248_v21 = vsub.f32 %v4041_v0, %v1247_v5  ;;  %v4303_v18 = vpack.c.bf16 %v1149_v63, %v1142_v47 }
  0xbf   : > { %v382_v27 = vmul.f32 0.00390625, %v296_v51  ;;  %v347_v41 = vpop.xlane.xlu1 %346  ;;  %v4298_v20 = vpack.c.bf16 %v1123_v12, %v1116_v46  ;;  %v1129_v48 = vsub.f32 %v4045_v10, %v1128_v13  ;;  %v1136_v39 = vsub.f32 %v4047_v37, %v1135_v60 }
  0xc0   : > { %v399_v44 = vmul.f32 0.00390625, %v347_v41  ;;  %5457 = vst [vmem:[#allocation81_spill] sm:$0xff] %v4292_v16  ;;  %5460 = vst [vmem:[#allocation84_spill] sm:$0xff] %v4303_v18  ;;  %v1249_v41 = vand.u32 4294901760, %v1248_v21  ;;  %v1268_v10 = vand.u32 4294901760, %v4112_v56  ;;  %v1275_v37 = vand.u32 4294901760, %v4114_v3 }
  0xc1   : > { %v569_v58 = vrot.slane %v382_v27, %v4185_v50  ;;  %5459 = vst [vmem:[#allocation83_spill] sm:$0xff] %v4298_v20  ;;  %v1242_v27 = vand.u32 4294901760, %v1241_v36  ;;  %v1130_v26 = vand.u32 4294901760, %v1129_v48  ;;  %v1137_v5 = vand.u32 4294901760, %v1136_v39 }
  0xc2   : > { %v676_v32 = vrot.slane %v399_v44, %v4190_v62  ;;  %v418_v8 = vpop.xlane.xlu0 %417  ;;  %v1156_v60 = vand.u32 4294901760, %v4121_v40  ;;  %v4321_v36 = vpack.c.bf16 %v1275_v37, %v1268_v10  ;;  %v1262_v21 = vsub.f32 %v4079_v54, %v1261_v6 }
  0xc3   : > { %v571_v2 = vsel %vm570_vm3, %v569_v58, %v564_v59  ;;  %v774_v51 = vrot.slane %v418_v8, %v4171_v24  ;;  %v469_v23 = vpop.xlane.xlu1 %468  ;;  %v4312_v12 = vpack.c.bf16 %v1249_v41, %v1242_v27  ;;  %v4317_v13 = vpack.c.bf16 %v1137_v5, %v1130_v26 }
  0xc4   : > { %v677_v4 = vsel %vm577_vm4, %v676_v32, %v672_v52  ;;  %v858_v0 = vrot.slane %v469_v23, %v4182_v17  ;;  %v1163_v52 = vand.u32 4294901760, %v4123_v49  ;;  %5463 = vst [vmem:[#allocation87_spill] sm:$0xff] %v4321_v36  ;;  %v1150_v48 = vsub.f32 %v4086_v28, %v1149_v63 }
  0xc5   : > { %v775_v46 = vsel %vm556_vm1, %v774_v51, %v770_v7  ;;  %5461 = vst [vmem:[#allocation85_spill] sm:$0xff] %v4312_v12  ;;  %5462 = vst [vmem:[#allocation86_spill] sm:$0xff] %v4317_v13  ;;  %v1255_v7 = vsub.f32 %v4077_v55, %v1254_v31  ;;  %v1263_v23 = vand.u32 4294901760, %v1262_v21  ;;  %v1282_v27 = vand.u32 4294901760, %v4152_v57 }
  0xc6   : > { %v859_v59 = vsel %vm563_vm2, %v858_v0, %v854_v45  ;;  %v299_v24 = vpop.xlane.xlu0 %298  ;;  %v4325_v8 = vpack.c.bf16 %v1163_v52, %v1156_v60  ;;  %v1143_v45 = vsub.f32 %v4084_v29, %v1142_v47  ;;  %v1151_v31 = vand.u32 4294901760, %v1150_v48 }
  0xc7   : > { %v383_v44 = vmul.f32 0.00390625, %v299_v24  ;;  %v350_v58 = vpop.xlane.xlu1 %349  ;;  %v1256_v51 = vand.u32 4294901760, %v1255_v7  ;;  %v1289_v54 = vand.u32 4294901760, %v4154_v14  ;;  %v1170_v63 = vand.u32 4294901760, %v4159_v11  ;;  %v5468_v7 = vld [vmem:[#allocation72_spill] sm:$0xff] }
  0xc8   : > { %v400_v32 = vmul.f32 0.00390625, %v350_v58  ;;  %5464 = vst [vmem:[#allocation88_spill] sm:$0xff] %v4325_v8  ;;  %v1144_v55 = vand.u32 4294901760, %v1143_v45  ;;  %v1177_v21 = vand.u32 4294901760, %v5468_v7  ;;  %v1157_v48 = vsub.f32 %v4121_v40, %v1156_v60 }
  0xc9   : > { %v576_v39 = vrot.slane %v383_v44, %v4190_v62  ;;  %v4335_v28 = vpack.c.bf16 %v1263_v23, %v1256_v51  ;;  %v4342_v44 = vpack.c.bf16 %v1289_v54, %v1282_v27  ;;  %v1290_v40 = vsub.f32 %v4154_v14, %v1289_v54 }
  0xca   : > { %v681_v41 = vrot.slane %v400_v32, %v4193_v15  ;;  %v421_v0 = vpop.xlane.xlu0 %420  ;;  %v4340_v24 = vpack.c.bf16 %v1151_v31, %v1144_v55  ;;  %v1158_v31 = vand.u32 4294901760, %v1157_v48  ;;  %vm1836_vm0 = vcmask 523264  }
  0xcb   : > { %v578_v6 = vsel %vm577_vm4, %v576_v39, %v571_v2  ;;  %v779_v29 = vrot.slane %v421_v0, %v4182_v17  ;;  %v472_v47 = vpop.xlane.xlu1 %471  ;;  %5465 = vst [vmem:[#allocation89_spill] sm:$0xff] %v4335_v28  ;;  %5467 = vst [vmem:[#allocation91_spill] sm:$0xff] %v4342_v44  ;;  %v1269_v2 = vsub.f32 %v4112_v56, %v1268_v10 }
  0xcc   : > { %v682_v26 = vsel %vm584_vm5, %v681_v41, %v677_v4  ;;  %v863_v5 = vrot.slane %v472_v47, %v4185_v50  ;;  %5466 = vst [vmem:[#allocation90_spill] sm:$0xff] %v4340_v24  ;;  %v1276_v17 = vsub.f32 %v4114_v3, %v1275_v37  ;;  %v1164_v4 = vsub.f32 %v4123_v49, %v1163_v52 }
  0xcd   : > { %v780_v58 = vsel %vm563_vm2, %v779_v29, %v775_v46  ;;  %v1283_v39 = vsub.f32 %v4152_v57, %v1282_v27  ;;  %v4352_v41 = vpack.c.bf16 %v1177_v21, %v1170_v63  ;;  %v1270_v46 = vand.u32 4294901760, %v1269_v2 }
  0xce   : > { %v864_v32 = vsel %vm570_vm3, %v863_v5, %v859_v59  ;;  %v302_v45 = vpop.xlane.xlu0 %301  ;;  %v1277_v0 = vand.u32 4294901760, %v1276_v17  ;;  %v1165_v56 = vand.u32 4294901760, %v1164_v4  ;;  %v1171_v49 = vsub.f32 %v4159_v11, %v1170_v63  ;;  %v5471_v59 = vld [vmem:[#allocation75_spill] sm:$0xff] }
  0xcf   : > { %v384_v51 = vmul.f32 0.00390625, %v302_v45  ;;  %v353_v23 = vpop.xlane.xlu1 %352  ;;  %5469 = vst [vmem:[#allocation72_spill] sm:$0xff] %v4352_v41  ;;  %v1284_v10 = vand.u32 4294901760, %v1283_v39  ;;  %v1178_v27 = vsub.f32 %v5468_v7, %v1177_v21  ;;  %v1291_v2 = vand.u32 4294901760, %v1290_v40 }
  0xd0   : > { %v401_v55 = vmul.f32 0.00390625, %v353_v23  ;;  %v4355_v37 = vpack.c.bf16 %v1277_v0, %v1270_v46  ;;  %v4360_v52 = vpack.c.bf16 %v1165_v56, %v1158_v31  ;;  %v1172_v17 = vand.u32 4294901760, %v1171_v49 }
  0xd1   : > { %v583_v3 = vrot.slane %v384_v51, %v4193_v15  ;;  %v1179_v11 = vand.u32 4294901760, %v1178_v27  ;;  %v4374_v63 = vpack.c.bf16 %v1291_v2, %v1284_v10 }
  0xd2   : > { %5470 = vst [vmem:[#allocation92_spill] sm:$0xff] %v4355_v37  ;;  %v686_v57 = vrot.slane %v401_v55, %v5471_v59  ;;  %v424_v60 = vpop.xlane.xlu0 %423  ;;  %5472 = vst [vmem:[#allocation75_spill] sm:$0xff] %v4360_v52 }
  0xd3   : > { %v4364_v29 = vsel %vm584_vm5, %v583_v3, %v578_v6  ;;  %v784_v47 = vrot.slane %v424_v60, %v4185_v50  ;;  %v475_v5 = vpop.xlane.xlu1 %474  ;;  %5473 = vst [vmem:[#allocation93_spill] sm:$0xff] %v4374_v63  ;;  %v4379_v21 = vpack.c.bf16 %v1179_v11, %v1172_v17  ;;  %v5476_v63 = vld [vmem:[#allocation65_spill] sm:$0xff] }
  0xd4   : > { %v4368_v45 = vsel %vm591_vm6, %v686_v57, %v682_v26  ;;  %v868_v14 = vrot.slane %v475_v5, %v4190_v62  ;;  %v5475_v5 = vld [vmem:[#allocation64_spill] sm:$0xff] }
  0xd5   : > { %v4372_v54 = vsel %vm570_vm3, %v784_v47, %v780_v58  ;;  %5474 = vst [vmem:[#allocation94_spill] sm:$0xff] %v4379_v21  ;;  %v593_v2 = vadd.s32 4294967232, %v5475_v5  ;;  %v607_v19 = vadd.s32 4294967216, %v5475_v5  ;;  %v614_v37 = vadd.s32 4294967208, %v5475_v5 }
  0xd6   : > { %v4377_v7 = vsel %vm577_vm4, %v868_v14, %v864_v32  ;;  %v305_v6 = vpop.xlane.xlu0 %304  ;;  %v600_v14 = vadd.s32 4294967224, %v5475_v5  ;;  %v621_v8 = vadd.s32 4294967200, %v5475_v5  ;;  %v635_v13 = vadd.s32 4294967184, %v5475_v5 }
  0xd7   : > { %v356_v50 = vpop.xlane.xlu1 %355  ;;  %v385_v11 = vmul.f32 0.00390625, %v305_v6  ;;  %v4415_v52 = vsub.s32 %v593_v2, %v5476_v63  ;;  %v628_v6 = vadd.s32 4294967192, %v5475_v5  ;;  %v642_v2 = vadd.s32 4294967176, %v5475_v5 }
  0xd8   : > { %v402_v41 = vmul.f32 0.00390625, %v356_v50  ;;  %v4421_v44 = vsub.s32 %v600_v14, %v5476_v63  ;;  %v4429_v18 = vsub.s32 %v607_v19, %v5476_v63  ;;  %v4444_v19 = vsub.s32 %v621_v8, %v5476_v63 }
  0xd9   : > { %v590_v50 = vrot.slane %v385_v11, %v5471_v59  ;;  %v4447_v11 = vsub.s32 %v628_v6, %v5476_v63 }
  0xda   : > { %v4381_v48 = vpop.xlane.xlu0 %426  ;;  %v691_v14 = vrot.slane %v402_v41, %v4415_v52 }
  0xdb   : > { %v4383_v4 = vpop.xlane.xlu1 %477  ;;  %v789_v20 = vrot.slane %v4381_v48, %v4190_v62  ;;  %v4451_v62 = vsub.s32 %v635_v13, %v5476_v63  ;;  %v592_v48 = vsel %vm591_vm6, %v590_v50, %v4364_v29 }
  0xdc   : > { %v692_v6 = vsel %vm598_vm7, %v691_v14, %v4368_v45 }
  0xde   : > { %v308_v26 = vpop.xlane.xlu0 %307 }
  0xdf   : > { %v359_v39 = vpop.xlane.xlu1 %358  ;;  %v386_v28 = vmul.f32 0.00390625, %v308_v26  ;;  %v4437_v26 = vsub.s32 %v614_v37, %v5476_v63  ;;  %v4454_v37 = vsub.s32 %v642_v2, %v5476_v63 }
  0xe0   : > { %v403_v36 = vmul.f32 0.00390625, %v359_v39  ;;  %v873_v39 = vrot.slane %v4383_v4, %v4193_v15 }
  0xe1   : > { %v597_v41 = vrot.slane %v386_v28, %v4415_v52  ;;  %v790_v28 = vsel %vm577_vm4, %v789_v20, %v4372_v54 }
  0xe2   : > { %v4385_v51 = vpop.xlane.xlu0 %429  ;;  %v696_v4 = vrot.slane %v403_v36, %v4421_v44  ;;  %v874_v63 = vsel %vm584_vm5, %v873_v39, %v4377_v7 }
  0xe3   : > { %v4387_v23 = vpop.xlane.xlu1 %480  ;;  %v794_v13 = vrot.slane %v4385_v51, %v4193_v15 }
  0xe4   : > { %v878_v36 = vrot.slane %v4387_v23, %v5471_v59  ;;  %v697_v54 = vsel %vm605_vm8, %v696_v4, %v692_v6 }
  0xe6   : > { %v311_v58 = vpop.xlane.xlu0 %310  ;;  %v879_v50 = vsel %vm591_vm6, %v878_v36, %v874_v63 }
  0xe7   : > { %v362_v46 = vpop.xlane.xlu1 %361  ;;  %v387_v5 = vmul.f32 0.00390625, %v311_v58 }
  0xe8   : > { %v404_v42 = vmul.f32 0.00390625, %v362_v46 }
  0xe9   : > { %v604_v29 = vrot.slane %v387_v5, %v4421_v44 }
  0xea   : > { %v4389_v0 = vpop.xlane.xlu0 %432  ;;  %v701_v45 = vrot.slane %v404_v42, %v4429_v18 }
  0xeb   : > { %v4391_v32 = vpop.xlane.xlu1 %483  ;;  %v799_v20 = vrot.slane %v4389_v0, %v5471_v59 }
  0xec   : > { %v883_v15 = vrot.slane %v4391_v32, %v4415_v52 }
  0xee   : > { %v314_v55 = vpop.xlane.xlu0 %313 }
  0xef   : > { %v365_v31 = vpop.xlane.xlu1 %364  ;;  %v388_v8 = vmul.f32 0.00390625, %v314_v55 }
  0xf0   : > { %v405_v58 = vmul.f32 0.00390625, %v365_v31  ;;  %v599_v31 = vsel %vm598_vm7, %v597_v41, %v592_v48 }
  0xf1   : > { %v611_v7 = vrot.slane %v388_v8, %v4429_v18  ;;  %v606_v14 = vsel %vm605_vm8, %v604_v29, %v599_v31 }
  0xf2   : > { %v4393_v56 = vpop.xlane.xlu0 %435  ;;  %v706_v51 = vrot.slane %v405_v58, %v4437_v26 }
  0xf3   : > { %v4395_v10 = vpop.xlane.xlu1 %486  ;;  %v804_v23 = vrot.slane %v4393_v56, %v4415_v52  ;;  %v702_v56 = vsel %vm612_vm9, %v701_v45, %v697_v54  ;;  %v613_v41 = vsel %vm612_vm9, %v611_v7, %v606_v14 }
  0xf4   : > { %v888_v42 = vrot.slane %v4395_v10, %v4421_v44  ;;  %v884_v10 = vsel %vm598_vm7, %v883_v15, %v879_v50  ;;  %v707_v63 = vsel %vm619_vm10, %v706_v51, %v702_v56 }
  0xf6   : > { %v317_v3 = vpop.xlane.xlu0 %316 }
  0xf7   : > { %v368_v40 = vpop.xlane.xlu1 %367  ;;  %v389_v46 = vmul.f32 0.00390625, %v317_v3 }
  0xf8   : > { %v406_v55 = vmul.f32 0.00390625, %v368_v40  ;;  %v795_v40 = vsel %vm584_vm5, %v794_v13, %v790_v28 }
  0xf9   : > { %v618_v59 = vrot.slane %v389_v46, %v4437_v26  ;;  %v800_v5 = vsel %vm591_vm6, %v799_v20, %v795_v40 }
  0xfa   : > { %v4397_v49 = vpop.xlane.xlu0 %438  ;;  %v711_v39 = vrot.slane %v406_v55, %v4444_v19  ;;  %v805_v48 = vsel %vm598_vm7, %v804_v23, %v800_v5 }
  0xfb   : > { %v4399_v57 = vpop.xlane.xlu1 %489  ;;  %v809_v52 = vrot.slane %v4397_v49, %v4421_v44  ;;  %v889_v49 = vsel %vm605_vm8, %v888_v42, %v884_v10  ;;  %v620_v8 = vsel %vm619_vm10, %v618_v59, %v613_v41 }
  0xfc   : > { %v712_v28 = vsel %vm626_vm11, %v711_v39, %v707_v63 }
  0xfd   : > { %v810_v13 = vsel %vm605_vm8, %v809_v52, %v805_v48 }
  0xfe   : > { %v4401_v60 = vpop.xlane.xlu0 %319 }
  0xff   : > { %v4403_v27 = vpop.xlane.xlu1 %370  ;;  %v390_v0 = vmul.f32 0.00390625, %v4401_v60  ;;  %v893_v60 = vrot.slane %v4399_v57, %v4429_v18 }
 0x100   : > { %v407_v4 = vmul.f32 0.00390625, %v4403_v27 }
 0x101   : > { %v625_v58 = vrot.slane %v390_v0, %v4444_v19  ;;  %v894_v36 = vsel %vm612_vm9, %v893_v60, %v889_v49 }
 0x102   : > { %v4405_v47 = vpop.xlane.xlu0 %441 }
 0x103   : > { %v4408_v17 = vpop.xlane.xlu1 %492  ;;  %v814_v46 = vrot.slane %v4405_v47, %v4429_v18  ;;  %v627_v18 = vsel %vm626_vm11, %v625_v58, %v620_v8 }
 0x104   : > { %v898_v29 = vrot.slane %v4408_v17, %v4437_v26 }
 0x106   : > { %v4412_v21 = vpop.xlane.xlu0 %322 }
 0x107   : > { %v4418_v24 = vpop.xlane.xlu1 %373  ;;  %v391_v6 = vmul.f32 0.00390625, %v4412_v21  ;;  %v716_v21 = vrot.slane %v407_v4, %v4447_v11 }
 0x108   : > { %v408_v27 = vmul.f32 0.00390625, %v4418_v24 }
 0x109   : > { %v632_v24 = vrot.slane %v391_v6, %v4447_v11 }
 0x10a   : > { %v4431_v12 = vpop.xlane.xlu0 %444  ;;  %v721_v7 = vrot.slane %v408_v27, %v4451_v62  ;;  %v5478_v27 = vld [vmem:[#allocation79_spill] sm:$0xff] }
 0x10b   : > { %v4439_v25 = vpop.xlane.xlu1 %495  ;;  %v819_v45 = vrot.slane %v4431_v12, %v4437_v26 }
 0x10c   : > { %v903_v20 = vrot.slane %v4439_v25, %v4444_v19  ;;  %v899_v25 = vsel %vm619_vm10, %v898_v29, %v894_v36 }
 0x10e   : > { %v326_v16 = vpop.xlane.xlu0 %325  ;;  %v904_v42 = vsel %vm626_vm11, %v903_v20, %v899_v25  ;;  %v5493_v20 = vld [vmem:[#allocation75_spill] sm:$0xff]  ;;  %v5505_v25 = vld [vmem:[#allocation69_spill] sm:$0xff] }
 0x10f   : > { %v377_v2 = vpop.xlane.xlu1 %376  ;;  %v392_v55 = vmul.f32 0.00390625, %v326_v16 }
 0x110   : > { %v409_v31 = vmul.f32 0.00390625, %v377_v2  ;;  %v815_v2 = vsel %vm612_vm9, %v814_v46, %v810_v13  ;;  %v5477_v13 = vld [vmem:[#allocation76_spill] sm:$0xff] }
 0x111   : > { %v639_v51 = vrot.slane %v392_v55, %v4451_v62 }
 0x112   : > { %v448_v3 = vpop.xlane.xlu0 %447  ;;  %v726_v23 = vrot.slane %v409_v31, %v4454_v37  ;;  %v5490_v31 = vld [vmem:[#allocation90_spill] sm:$0xff] }
 0x113   : > { %v499_v32 = vpop.xlane.xlu1 %498  ;;  %v824_v47 = vrot.slane %v448_v3, %v4444_v19  ;;  %v717_v19 = vsel %vm633_vm12, %v716_v21, %v712_v28  ;;  %v820_v3 = vsel %vm619_vm10, %v819_v45, %v815_v2  ;;  %v5491_v21 = vld [vmem:[#allocation92_spill] sm:$0xff]  ;;  %v5501_v2 = vld [vmem:[#allocation63_spill] sm:$0xff] }
 0x114   : > { %v908_v17 = vrot.slane %v499_v32, %v4447_v11  ;;  %v5492_v45 = vld [vmem:[#allocation72_spill] sm:$0xff] }
 0x115   : > { %v825_v32 = vsel %vm626_vm11, %v824_v47, %v820_v3  ;;  %v5498_v47 = vld [vmem:[#allocation60_spill] sm:$0xff]  ;;  %v5510_v3 = vld [vmem:[#allocation77_spill] sm:$0xff] }
 0x116   : > { %v329_v44 = vpop.xlane.xlu0 %328  ;;  %v909_v50 = vsel %vm633_vm12, %v908_v17, %v904_v42  ;;  %v5499_v17 = vld [vmem:[#allocation61_spill] sm:$0xff]  ;;  %v5511_v42 = vld [vmem:[#allocation78_spill] sm:$0xff] }
 0x117   : > { %v451_v57 = vpop.xlane.xlu1 %450  ;;  %v393_v15 = vmul.f32 0.00390625, %v329_v44 }
 0x118   : > { %v829_v12 = vrot.slane %v451_v57, %v4447_v11  ;;  %v634_v11 = vsel %vm633_vm12, %v632_v24, %v627_v18  ;;  %v5496_v18 = vld [vmem:[#allocation58_spill] sm:$0xff]  ;;  %v5497_v24 = vld [vmem:[#allocation59_spill] sm:$0xff] }
 0x119   : > { %v646_v59 = vrot.slane %v393_v15, %v4454_v37  ;;  %v641_v10 = vsel %vm640_vm13, %v639_v51, %v634_v11  ;;  %v5494_v15 = vld [vmem:[#allocation93_spill] sm:$0xff]  ;;  %v5506_v51 = vld [vmem:[#allocation70_spill] sm:$0xff] }
 0x11a   : > { %v502_v54 = vpop.xlane.xlu0 %501  ;;  %v830_v52 = vsel %vm633_vm12, %v829_v12, %v825_v32  ;;  %v5503_v12 = vld [vmem:[#allocation67_spill] sm:$0xff]  ;;  %v4641_v11 = vld [vmem:[%s5217_s3] sm:$0xff] }
 0x11b   : > { %v454_v16 = vpop.xlane.xlu1 %453  ;;  %v913_v26 = vrot.slane %v502_v54, %v4451_v62  ;;  %v648_v48 = vsel %vm647_vm14, %v646_v59, %v641_v10  ;;  %v5495_v54 = vld [vmem:[#allocation94_spill] sm:$0xff]  ;;  %v4631_v59 = vld [vmem:[%s5217_s3 + $0x8] sm:$0xff] }
 0x11c   : > { %v834_v40 = vrot.slane %v454_v16, %v4451_v62  ;;  %v722_v62 = vsel %vm640_vm13, %v721_v7, %v717_v19  ;;  %v5500_v16 = vld [vmem:[#allocation62_spill] sm:$0xff]  ;;  %v1840_v32 = vand.u32 4294901760, %v4631_v59 }
 0x11d   : > { %v914_v56 = vsel %vm640_vm13, %v913_v26, %v909_v50  ;;  %v727_v60 = vsel %vm647_vm14, %v726_v23, %v722_v62  ;;  %v5502_v7 = vld [vmem:[#allocation66_spill] sm:$0xff]  ;;  %v5504_v26 = vld [vmem:[#allocation68_spill] sm:$0xff]  ;;  %v5507_v23 = vld [vmem:[#allocation71_spill] sm:$0xff] }
 0x11e   : > { %v505_v0 = vpop.xlane.xlu0 %504  ;;  %v835_v41 = vsel %vm640_vm13, %v834_v40, %v830_v52  ;;  %v5508_v40 = vld [vmem:[#allocation73_spill] sm:$0xff]  ;;  %v5509_v19 = vld [vmem:[#allocation74_spill] sm:$0xff]  ;;  %v4654_v62 = vld [vmem:[%s5217_s3 + $0x28] sm:$0xff] }
 0x11f   : > { %v918_v14 = vrot.slane %v505_v0, %v4454_v37  ;;  %v457_v39 = vpop.xlane.xlu1 %456  ;;  %v4636_v0 = vld [vmem:[%s5217_s3 + $0x18] sm:$0xff] }
 0x120   : > { %v839_v5 = vrot.slane %v457_v39, %v4454_v37  ;;  %v1844_v50 = vand.u32 4294901760, %v4636_v0  ;;  %v1842_v39 = vand.u32 4294901760, %v4641_v11  ;;  %v4659_v52 = vld [vmem:[%s5217_s3 + $0x38] sm:$0xff] }
 0x121   : > { %v919_v63 = vsel %vm647_vm14, %v918_v14, %v914_v56  ;;  %v4648_v14 = vld [vmem:[%s5217_s3 + $0x10] sm:$0xff]  ;;  %v1852_v10 = vand.u32 4294901760, %v4659_v52 }
 0x122   : > { %v840_v4 = vsel %vm647_vm14, %v839_v5, %v835_v41  ;;  %v924_v44 = vsel %vm922_vm15, %v727_v60, %v919_v63  ;;  %v1846_v56 = vand.u32 4294901760, %v4648_v14  ;;  %v1848_v5 = vand.u32 4294901760, %v4654_v62  ;;  %v4667_v60 = vld [vmem:[%s5217_s3 + $0x20] sm:$0xff]  ;;  %v4672_v41 = vld [vmem:[%s5217_s3 + $0x30] sm:$0xff] }
 0x123   : > { %v4548_v49 = vand.u32 4294901760, %v924_v44  ;;  %v923_v8 = vsel %vm922_vm15, %v648_v48, %v840_v4  ;;  %v4677_v63 = vsub.f32 %v4631_v59, %v1840_v32  ;;  %v4682_v48 = vsub.f32 %v4636_v0, %v1844_v50 }
 0x124   : > { %v4551_v58 = vand.u32 4294901760, %v923_v8  ;;  %v4687_v4 = vsub.f32 %v4641_v11, %v1842_v39 }
 0x125   : > { %v1054_v37 = vsub.f32 %v924_v44, %v4548_v49  ;;  %v1850_v44 = vand.u32 4294901760, %v4667_v60 }
 0x126   : > { %v4555_v6 = vsub.f32 %v923_v8, %v4551_v58  ;;  %v4698_v8 = vsub.f32 %v4654_v62, %v1848_v5 }
 0x127   : > { %1431 = vmatprep.mubr.f32.mxu0 %v1054_v37  ;;  %v1055_v57 = vand.u32 4294901760, %v1054_v37 }
 0x128   : > { %1434 = vmatmul.mubr.f32.vlgmr.msra.gmra.mrb[0].mxu0 %v4555_v6  ;;  %v1061_v28 = vand.u32 4294901760, %v4555_v6 }
 0x129   : > { %3387 = vmatpush3.bf16.msra.mxu0 %v5477_v13  ;;  %1708 = vmatprep.mubr.f32.mxu0 %v4548_v49  ;;  %v1056_v46 = vsub.f32 %v1054_v37, %v1055_v57  ;;  %v1854_v37 = vand.u32 4294901760, %v4672_v41  ;;  %v4712_v13 = vsub.f32 %v4667_v60, %v1850_v44 }
 0x12a   : > { %3389 = vmatprep.subr.bf16.mxu0 %v5478_v27  ;;  %v1062_v36 = vsub.f32 %v4555_v6, %v1061_v28  ;;  %v1934_v6 = vand.u32 4294901760, %v4677_v63  ;;  %v5377_v27 = vand.u32 4294901760, %v4698_v8 }
 0x12b   : > { %v1057_v29 = vand.u32 4294901760, %v1056_v46 }
 0x12c   : > { %v1063_v55 = vand.u32 4294901760, %v1062_v36 }
 0x12d   : > { %3391 = vmatpush3.bf16.msra.mxu0 %v4220_v1  ;;  %1058 = vmatprep.mubr.f32.mxu1 %v1057_v29  ;;  %v5479_v1 = vld [vmem:[#allocation81_spill] sm:$0xff]  ;;  %v4720_v29 = vsub.f32 %v4672_v41, %v1854_v37 }
 0x12e   : > { %1064 = vmatmul.mubr.f32.vlgmr.msra.gmra.mrb[0].mxu1 %v1063_v55  ;;  %3393 = vmatprep.subr.bf16.mxu0 %v4234_v30  ;;  %v5480_v30 = vld [vmem:[#allocation80_spill] sm:$0xff]  ;;  %v1935_v55 = vsub.f32 %v4677_v63, %v1934_v6 }
 0x12f   : > { %3291 = vmatpush3.bf16.msra.mxu1 %v4238_v38  ;;  %1294 = vmatprep.mubr.f32.mxu1 %v4548_v49  ;;  %v5481_v38 = vld [vmem:[#allocation82_spill] sm:$0xff]  ;;  %v3486_v41 = vpack.c.bf16 %v4720_v29, %v4712_v13 }
 0x130   : > { %3293 = vmatprep.subr.bf16.mxu1 %v4251_v34  ;;  %v5482_v34 = vld [vmem:[#allocation83_spill] sm:$0xff] }
 0x131   : > { %3395 = vmatpush3.bf16.msra.mxu0 %v4240_v22  ;;  %v5483_v22 = vld [vmem:[#allocation85_spill] sm:$0xff] }
 0x132   : > { %3397 = vmatprep.subr.bf16.mxu0 %v4253_v43  ;;  %v5484_v43 = vld [vmem:[#allocation84_spill] sm:$0xff] }
 0x133   : > { %3295 = vmatpush3.bf16.msra.mxu1 %v4257_v33  ;;  %v5485_v33 = vld [vmem:[#allocation87_spill] sm:$0xff] }
 0x134   : > { %3297 = vmatprep.subr.bf16.mxu1 %v4269_v35  ;;  %v5486_v35 = vld [vmem:[#allocation86_spill] sm:$0xff] }
 0x135   : > { %3399 = vmatpush3.bf16.msra.mxu0 %v4261_v53  ;;  %v5487_v53 = vld [vmem:[#allocation89_spill] sm:$0xff] }
 0x136   : > { %3401 = vmatprep.subr.bf16.mxu0 %v4280_v61  ;;  %v5488_v61 = vld [vmem:[#allocation88_spill] sm:$0xff] }
 0x137   : > { %3299 = vmatpush3.bf16.msra.mxu1 %v4276_v9  ;;  %v5489_v9 = vld [vmem:[#allocation91_spill] sm:$0xff] }
 0x138   : > { %3301 = vmatprep.subr.bf16.mxu1 %v5479_v1 }
 0x139   : > { %3403 = vmatpush3.bf16.msra.mxu0 %v5480_v30 }
 0x13a   : > { %3405 = vmatprep.subr.bf16.mxu0 %v5481_v38  ;;  %v5374_v38 = vand.u32 4294901760, %v4712_v13 }
 0x13b   : > { %3303 = vmatpush3.bf16.msra.mxu1 %v5482_v34 }
 0x13c   : > { %3305 = vmatprep.subr.bf16.mxu1 %v5483_v22  ;;  %v1959_v22 = vsub.f32 %v4698_v8, %v5377_v27 }
 0x13d   : > { %3407 = vmatpush3.bf16.msra.mxu0 %v5484_v43 }
 0x13e   : > { %3409 = vmatprep.subr.bf16.mxu0 %v5485_v33  ;;  %v5373_v33 = vand.u32 4294901760, %v4720_v29 }
 0x13f   : > { %3307 = vmatpush3.bf16.msra.mxu1 %v5486_v35  ;;  %v1936_v35 = vand.u32 4294901760, %v1935_v55  ;;  %v4793_v55 = vld [vmem:[%s5217_s3 + $0x68] sm:$0xff] }
 0x140   : > { %3309 = vmatprep.subr.bf16.mxu1 %v5487_v53 }
 0x141   : > { %3411 = vmatpush3.bf16.msra.mxu0 %v5488_v61 }
 0x142   : > { %3413 = vmatprep.subr.bf16.mxu0 %v5489_v9  ;;  %v1965_v9 = vsub.f32 %v4712_v13, %v5374_v38 }
 0x143   : > { %3311 = vmatpush3.bf16.msra.mxu1 %v5490_v31 }
 0x144   : > { %3313 = vmatprep.subr.bf16.mxu1 %v5491_v21  ;;  %v1960_v21 = vand.u32 4294901760, %v1959_v22  ;;  %v1864_v22 = vand.u32 4294901760, %v4793_v55 }
 0x145   : > { %3415 = vmatpush3.bf16.msra.mxu0 %v5492_v45 }
 0x147   : > { %3315 = vmatpush3.bf16.msra.mxu1 %v5493_v20  ;;  %v1977_v20 = vsub.f32 %v4720_v29, %v5373_v33 }
 0x148   : > { %1710 = vmatmul.mubr.f32.vlgmr.msra.gmra.mrb[2].mxu0 %v4551_v58  ;;  %3317 = vmatprep.subr.bf16.mxu1 %v5494_v15 }
 0x14b   : > { %3319 = vmatpush3.bf16.msra.mxu1 %v5495_v54  ;;  %v1966_v54 = vand.u32 4294901760, %v1965_v9 }
 0x14c   : > { %3353 = vmatprep.subr.bf16.mxu1 %v5496_v18 }
 0x14e   : > { %1296 = vmatmul.mubr.f32.vlgmr.msra.gmra.mrb[2].mxu1 %v4551_v58 }
 0x14f   : > { %3355 = vmatpush3.bf16.msra.mxu1 %v5497_v24  ;;  %1538 = vmatprep.mubr.f32.mxu1 %v1055_v57  ;;  %v1946_v57 = vand.u32 4294901760, %v4682_v48 }
 0x150   : > { %3357 = vmatprep.subr.bf16.mxu1 %v5498_v47 }
 0x151   : > { %v1947_v1 = vsub.f32 %v4682_v48, %v1946_v57 }
 0x153   : > { %3359 = vmatpush3.bf16.msra.mxu1 %v5499_v17  ;;  %v1948_v53 = vand.u32 4294901760, %v1947_v1  ;;  %v4798_v1 = vld [vmem:[%s5217_s3 + $0x78] sm:$0xff] }
 0x154   : > { %3361 = vmatprep.subr.bf16.mxu1 %v5500_v16 }
 0x155   : > { %v3464_v15 = vpack.c.bf16 %v1948_v53, %v1936_v35  ;;  %v1832_v35 = vld [vmem:[%s5217_s3 + $0x60] sm:$0xff]  ;;  %v1834_v53 = vld [vmem:[%s5217_s3 + $0x70] sm:$0xff] }
 0x157   : > { %3363 = vmatpush3.bf16.msra.mxu1 %v5501_v2  ;;  %3465 = vmatprep.subr.bf16.mxu0 %v3464_v15  ;;  %v4819_v15 = vsub.f32 %v4793_v55, %v1864_v22 }
 0x158   : > { %3365 = vmatprep.subr.bf16.mxu1 %v5502_v7 }
 0x159   : > { %v2006_v55 = vand.u32 4294901760, %v4819_v15 }
 0x15b   : > { %3367 = vmatpush3.bf16.msra.mxu1 %v5503_v12  ;;  %v2007_v27 = vsub.f32 %v4819_v15, %v2006_v55 }
 0x15c   : > { %3369 = vmatprep.subr.bf16.mxu1 %v5504_v26 }
 0x15f   : > { %3371 = vmatpush3.bf16.msra.mxu1 %v5505_v25 }
 0x160   : > { %3373 = vmatprep.subr.bf16.mxu1 %v5506_v51 }
 0x163   : > { %3375 = vmatpush3.bf16.msra.mxu1 %v5507_v23 }
 0x164   : > { %3377 = vmatprep.subr.bf16.mxu1 %v5508_v40 }
 0x167   : > { %3379 = vmatpush3.bf16.msra.mxu1 %v5509_v19 }
 0x168   : > { %3381 = vmatprep.subr.bf16.mxu1 %v5510_v3 }
 0x16b   : > { %3383 = vmatpush3.bf16.msra.mxu1 %v5511_v42 }
 0x16c   : > { %3417 = vmatprep.subr.bf16.mxu1 %v5496_v18 }
 0x16e   : > { %1542 = vmatmul.mubr.f32.vlgmr.msra.gmra.mrb[4].mxu1 %v1061_v28  ;;  %v1940_v28 = vand.u32 4294901760, %v4687_v4 }
 0x16f   : > { %3419 = vmatpush3.bf16.msra.mxu1 %v5497_v24  ;;  %1812 = vmatprep.mubr.f32.mxu1 %v4548_v49  ;;  %v4693_v49 = vsub.f32 %v4648_v14, %v1846_v56  ;;  %v4866_v14 = vpack.c.bf16 %v1854_v37, %v1850_v44 }
 0x170   : > { %3421 = vmatprep.subr.bf16.mxu1 %v5498_v47  ;;  %v1941_v30 = vsub.f32 %v4687_v4, %v1940_v28  ;;  %v1978_v47 = vand.u32 4294901760, %v1977_v20 }
 0x171   : > { %v1952_v46 = vand.u32 4294901760, %v4693_v49 }
 0x172   : > { %v1942_v61 = vand.u32 4294901760, %v1941_v30 }
 0x173   : > { %3423 = vmatpush3.bf16.msra.mxu1 %v5499_v17  ;;  %v1953_v34 = vsub.f32 %v4693_v49, %v1952_v46  ;;  %v3470_v17 = vpack.c.bf16 %v1978_v47, %v1966_v54 }
 0x174   : > { %3425 = vmatprep.subr.bf16.mxu1 %v5500_v16  ;;  %v4751_v16 = vld [vmem:[%s5217_s3 + $0x48] sm:$0xff] }
 0x175   : > { %v1954_v31 = vand.u32 4294901760, %v1953_v34 }
 0x177   : > { %3427 = vmatpush3.bf16.msra.mxu1 %v5501_v2  ;;  %v3466_v18 = vpack.c.bf16 %v1954_v31, %v1942_v61  ;;  %v4756_v2 = vld [vmem:[%s5217_s3 + $0x58] sm:$0xff]  ;;  %v1866_v31 = vand.u32 4294901760, %v1832_v35 }
 0x178   : > { %3429 = vmatprep.subr.bf16.mxu1 %v5502_v7  ;;  %v1856_v7 = vand.u32 4294901760, %v4751_v16 }
 0x179   : > { %3467 = vmatpush1.bf16.msra.mxu0 %v3466_v18  ;;  %v4830_v47 = vsub.f32 %v1832_v35, %v1866_v31 }
 0x17b   : > { %3431 = vmatpush3.bf16.msra.mxu1 %v5503_v12  ;;  %v1860_v12 = vand.u32 4294901760, %v4756_v2  ;;  %v2012_v38 = vand.u32 4294901760, %v4830_v47 }
 0x17c   : > { %3433 = vmatprep.subr.bf16.mxu1 %v5504_v26  ;;  %v4763_v26 = vld [vmem:[%s5217_s3 + $0x40] sm:$0xff] }
 0x17d   : > { %v4874_v62 = vpack.c.bf16 %v1860_v12, %v1856_v7 }
 0x17f   : > { %3435 = vmatpush3.bf16.msra.mxu1 %v5505_v25  ;;  %v4768_v25 = vld [vmem:[%s5217_s3 + $0x50] sm:$0xff] }
 0x180   : > { %3437 = vmatprep.subr.bf16.mxu1 %v5506_v51  ;;  %v1858_v51 = vand.u32 4294901760, %v4763_v26 }
 0x183   : > { %3439 = vmatpush3.bf16.msra.mxu1 %v5507_v23  ;;  %v1862_v23 = vand.u32 4294901760, %v4768_v25 }
 0x184   : > { %3441 = vmatprep.subr.bf16.mxu1 %v5508_v40  ;;  %v4775_v40 = vsub.f32 %v4751_v16, %v1856_v7 }
 0x186   : > { %v5372_v30 = vand.u32 4294901760, %v4775_v40 }
 0x187   : > { %3443 = vmatpush3.bf16.msra.mxu1 %v5509_v19  ;;  %v4778_v19 = vsub.f32 %v4756_v2, %v1860_v12 }
 0x188   : > { %3445 = vmatprep.subr.bf16.mxu1 %v5510_v3  ;;  %v4783_v3 = vsub.f32 %v4763_v26, %v1858_v51 }
 0x189   : > { %v5371_v34 = vand.u32 4294901760, %v4778_v19  ;;  %v3488_v37 = vpack.c.bf16 %v4778_v19, %v4775_v40 }
 0x18a   : > { %v5375_v61 = vand.u32 4294901760, %v4783_v3 }
 0x18b   : > { %3447 = vmatpush3.bf16.msra.mxu1 %v5511_v42  ;;  %v4788_v42 = vsub.f32 %v4768_v25, %v1862_v23  ;;  %v1995_v20 = vsub.f32 %v4778_v19, %v5371_v34 }
 0x18c   : > { %v1989_v18 = vsub.f32 %v4783_v3, %v5375_v61 }
 0x18d   : > { %v2000_v9 = vand.u32 4294901760, %v4788_v42  ;;  %v1996_v34 = vand.u32 4294901760, %v1995_v20  ;;  %v2013_v20 = vsub.f32 %v4830_v47, %v2012_v38 }
 0x18e   : > { %1814 = vmatmul.mubr.f32.vlgmr.msra.gmra.mrb[6].mxu1 %v4551_v58  ;;  %v4703_v58 = vsub.f32 %v4659_v52, %v1852_v10  ;;  %v3482_v52 = vpack.c.bf16 %v4693_v49, %v4687_v4  ;;  %v5518_v4 = vand.u32 4294901760, %v4783_v3 }
 0x18f   : > { %v2014_v59 = vand.u32 4294901760, %v2013_v20 }
 0x190   : > { %v5376_v36 = vand.u32 4294901760, %v4703_v58  ;;  %v3522_v49 = vpack.c.bf16 %v2000_v9, %v5518_v4 }
 0x192   : > { %v1971_v43 = vsub.f32 %v4703_v58, %v5376_v36 }
 0x194   : > { %v1972_v45 = vand.u32 4294901760, %v1971_v43  ;;  %v1868_v43 = vand.u32 4294901760, %v4798_v1 }
 0x196   : > { %v3468_v24 = vpack.c.bf16 %v1972_v45, %v1960_v21  ;;  %v1870_v21 = vand.u32 4294901760, %v1834_v53  ;;  %v1983_v45 = vsub.f32 %v4775_v40, %v5372_v30  ;;  %v4822_v54 = vsub.f32 %v4798_v1, %v1868_v43 }
 0x197   : > { %v1990_v1 = vand.u32 4294901760, %v1989_v18  ;;  %v4890_v60 = vpack.c.bf16 %v1868_v43, %v1864_v22  ;;  %v3514_v22 = vpack.c.bf16 %v1952_v46, %v1940_v28  ;;  %v5512_v43 = vand.u32 4294901760, %v4698_v8 }
 0x198   : > { %3469 = vmatprep.subr.bf16.mxu0 %v3468_v24  ;;  %v2001_v24 = vsub.f32 %v4788_v42, %v2000_v9  ;;  %v1984_v2 = vand.u32 4294901760, %v1983_v45  ;;  %v2018_v30 = vand.u32 4294901760, %v4822_v54  ;;  %v4895_v44 = vpack.c.bf16 %v1870_v21, %v1866_v31 }
 0x199   : > { %3471 = vmatpush1.bf16.msra.mxu0 %v3470_v17  ;;  %v4832_v17 = vsub.f32 %v1834_v53, %v1870_v21  ;;  %v4844_v53 = vpack.c.bf16 %v1844_v50, %v1840_v32  ;;  %v4860_v50 = vpack.c.bf16 %v1852_v10, %v1848_v5  ;;  %v4884_v5 = vpack.c.bf16 %v1862_v23, %v1858_v51 }
 0x19a   : > { %v2002_v33 = vand.u32 4294901760, %v2001_v24  ;;  %v3472_v36 = vpack.c.bf16 %v1996_v34, %v1984_v2  ;;  %v2019_v35 = vsub.f32 %v4822_v54, %v2018_v30  ;;  %v4852_v34 = vpack.c.bf16 %v1846_v56, %v1842_v39 }
 0x19b   : > { %v2024_v61 = vand.u32 4294901760, %v4832_v17  ;;  %v2008_v24 = vand.u32 4294901760, %v2007_v27  ;;  %3449 = vmatprep.subr.bf16.mxu1 %v4844_v53  ;;  %v3480_v39 = vpack.c.bf16 %v4682_v48, %v4677_v63  ;;  %v3587_v56 = vmov 0.0  }
 0x19c   : > { %v3474_v45 = vpack.c.bf16 %v2002_v33, %v1990_v1  ;;  %3473 = vmatprep.subr.bf16.mxu0 %v3472_v36  ;;  %v2020_v2 = vand.u32 4294901760, %v2019_v35  ;;  %3451 = vmatpush1.bf16.msra.mxu1 %v4852_v34  ;;  %v3484_v10 = vpack.c.bf16 %v4703_v58, %v4698_v8  ;;  %v3490_v27 = vpack.c.bf16 %v4788_v42, %v4783_v3 }
 0x19d   : > { %v2025_v18 = vsub.f32 %v4832_v17, %v2024_v61  ;;  %3453 = vmatprep.subr.bf16.mxu1 %v4860_v50  ;;  %2076 = vmatprep.mubr.f32.mxu0 %v3587_v56  ;;  %v3492_v36 = vpack.c.bf16 %v4822_v54, %v4819_v15  ;;  %v3494_v33 = vpack.c.bf16 %v4832_v17, %v4830_v47  ;;  %v5513_v31 = vand.u32 4294901760, %v4703_v58 }
 0x19e   : > { %3475 = vmatpush1.bf16.msra.mxu0 %v3474_v45  ;;  %v3476_v32 = vpack.c.bf16 %v2020_v2, %v2008_v24  ;;  %1920 = vmatprep.mubr.f32.mxu1 %v3587_v56  ;;  %v3512_v23 = vpack.c.bf16 %v1946_v57, %v1934_v6  ;;  %v5514_v15 = vand.u32 4294901760, %v4712_v13  ;;  %v5515_v54 = vand.u32 4294901760, %v4720_v29 }
 0x19f   : > { %v2026_v0 = vand.u32 4294901760, %v2025_v18  ;;  %v3516_v21 = vpack.c.bf16 %v5513_v31, %v5512_v43  ;;  %v5516_v63 = vand.u32 4294901760, %v4775_v40  ;;  %v5517_v48 = vand.u32 4294901760, %v4778_v19  ;;  %v3571_v31 = vld [vmem:[%s3627_s20 + $0x10] sm:$0xff] }
 0x1a0   : > { %3477 = vmatprep.subr.bf16.mxu0 %v3476_v32  ;;  %3455 = vmatpush1.bf16.msra.mxu1 %v4866_v14  ;;  %v3518_v47 = vpack.c.bf16 %v5515_v54, %v5514_v15  ;;  %v3524_v57 = vpack.c.bf16 %v2018_v30, %v2006_v55  ;;  %v3526_v8 = vpack.c.bf16 %v2024_v61, %v2012_v38  ;;  %v3572_v15 = vld [vmem:[%s3627_s20 + $0x18] sm:$0xff] }
 0x1a1   : > { %v3478_v11 = vpack.c.bf16 %v2026_v0, %v2014_v59  ;;  %3457 = vmatprep.subr.bf16.mxu1 %v4874_v62  ;;  %v3520_v6 = vpack.c.bf16 %v5517_v48, %v5516_v63  ;;  %v3574_v48 = vld [vmem:[%s3627_s20 + $0x8] sm:$0xff] }
 0x1a3   : > { %3479 = vmatpush1.bf16.msra.mxu0 %v3478_v11 }
 0x1a4   : > { %3481 = vmatprep.subr.bf16.mxu0 %v3480_v39  ;;  %3459 = vmatpush1.bf16.msra.mxu1 %v4884_v5 }
 0x1a5   : > { %3461 = vmatprep.subr.bf16.mxu1 %v4890_v60 }
 0x1a8   : > { %3463 = vmatpush1.bf16.msra.mxu1 %v4895_v44 }
 0x1fb   : > { %v3148_v16 = vpop.f32.mrb[0].mxu0 }
 0x1fc   : > { %v3149_v7 = vpop.f32.mrb[1].mxu0 }
 0x1fd   : > { %v3150_v12 = vadd.f32 %v3149_v7, %v3148_v16 }
 0x201   : > { %v3078_v26 = vpop.f32.mrb[0].mxu1 }
 0x202   : > { %v3079_v25 = vpop.f32.mrb[1].mxu1 }
 0x203   : > { %v3080_v51 = vadd.f32 %v3079_v25, %v3078_v26  ;;  %v2707_v26 = vld [vmem:[%s4955_s27 + $0x10] sm:$0xff]  ;;  %v2708_v25 = vld [vmem:[%s4955_s27 + $0x18] sm:$0xff] }
 0x21b   : > { %v3218_v28 = vpop.f32.mrb[2].mxu0 }
 0x21c   : > { %v3219_v58 = vpop.f32.mrb[3].mxu0 }
 0x21d   : > { %v3220_v46 = vadd.f32 %v3219_v58, %v3218_v28  ;;  %v2709_v28 = vld [vmem:[%s4955_s27 + $0x20] sm:$0xff] }
 0x221   : > { %v3113_v17 = vpop.f32.mrb[2].mxu1 }
 0x222   : > { %v3114_v13 = vpop.f32.mrb[3].mxu1 }
 0x223   : > { %v3115_v1 = vadd.f32 %v3114_v13, %v3113_v17 }
 0x225   : > { %v1298_v29 = vadd.f32 %v3115_v1, %v3080_v51 }
 0x227   : > { %v1436_v35 = vadd.f32 %v3150_v12, %v1298_v29 }
 0x241   : > { %v3183_v45 = vpop.f32.mrb[4].mxu1 }
 0x242   : > { %v3184_v40 = vpop.f32.mrb[5].mxu1 }
 0x243   : > { %v3185_v20 = vadd.f32 %v3184_v40, %v3183_v45  ;;  %v2713_v45 = vld [vmem:[%s4955_s27 + $0x40] sm:$0xff]  ;;  %v2714_v40 = vld [vmem:[%s4955_s27 + $0x48] sm:$0xff] }
 0x245   : > { %v1544_v19 = vadd.f32 %v3185_v20, %v1436_v35  ;;  %v2710_v35 = vld [vmem:[%s4955_s27 + $0x28] sm:$0xff]  ;;  %v3575_v20 = vld [vmem:[%s3627_s20 + $0x20] sm:$0xff] }
 0x247   : > { %v1712_v18 = vadd.f32 %v3220_v46, %v1544_v19 }
 0x261   : > { %v3253_v24 = vpop.f32.mrb[6].mxu1 }
 0x262   : > { %v3254_v3 = vpop.f32.mrb[7].mxu1 }
 0x263   : > { %v3255_v2 = vadd.f32 %v3254_v3, %v3253_v24  ;;  %v3577_v3 = vld [vmem:[%s3627_s20 + $0x40] sm:$0xff] }
 0x265   : > { %v1816_v42 = vadd.f32 %v3255_v2, %v1712_v18  ;;  %v3576_v18 = vld [vmem:[%s3627_s20 + $0x28] sm:$0xff] }
 0x267   : > { %v1819_v30 = vmax.f32 %v1816_v42, 0.0  ;;  %v3578_v42 = vld [vmem:[%s3627_s20 + $0x48] sm:$0xff] }
 0x269   : > { %v1838_v38 = vsel %vm1836_vm0, %v1819_v30, 0 }
 0x26a   : > { %v1921_v61 = vand.u32 4294901760, %v1838_v38 }
 0x26c   : > { %v1922_v9 = vsub.f32 %v1838_v38, %v1921_v61  ;;  %2078 = vmatmul.mubr.f32.vlgmr.msra.gmra.mrb[4].mxu0 %v1921_v61  ;;  %v2711_v38 = vld [vmem:[%s4955_s27 + $0x30] sm:$0xff] }
 0x26d   : > { %3483 = vmatpush1.bf16.msra.mxu0 %v3482_v52  ;;  %2180 = vmatprep.mubr.f32.mxu0 %v3587_v56 }
 0x26e   : > { %3485 = vmatprep.subr.bf16.mxu0 %v3484_v10  ;;  %v1923_v55 = vand.u32 4294901760, %v1922_v9 }
 0x270   : > { %v1924_v59 = vsub.f32 %v1922_v9, %v1923_v55 }
 0x271   : > { %3487 = vmatpush1.bf16.msra.mxu0 %v3486_v41 }
 0x272   : > { %3489 = vmatprep.subr.bf16.mxu0 %v3488_v37  ;;  %v1925_v0 = vand.u32 4294901760, %v1924_v59 }
 0x274   : > { %1926 = vmatmul.mubr.f32.vlgmr.msra.gmra.mrb[8].mxu1 %v1925_v0  ;;  %v2712_v0 = vld [vmem:[%s4955_s27 + $0x38] sm:$0xff] }
 0x275   : > { %3491 = vmatpush1.bf16.msra.mxu0 %v3490_v27 }
 0x276   : > { %3493 = vmatprep.subr.bf16.mxu0 %v3492_v36 }
 0x279   : > { %3495 = vmatpush1.bf16.msra.mxu0 %v3494_v33 }
 0x27a   : > { %3497 = vmatprep.subr.bf16.mxu0 %v4844_v53 }
 0x27c   : > { %2183 = vmatmul.mubr.f32.vlgmr.msra.gmra.mrb[4].mxu0 %v1922_v9 }
 0x27d   : > { %3499 = vmatpush1.bf16.msra.mxu0 %v4852_v34  ;;  %2269 = vmatprep.mubr.f32.mxu0 %v3587_v56 }
 0x27e   : > { %3501 = vmatprep.subr.bf16.mxu0 %v4860_v50 }
 0x281   : > { %3503 = vmatpush1.bf16.msra.mxu0 %v4866_v14 }
 0x282   : > { %3505 = vmatprep.subr.bf16.mxu0 %v4874_v62 }
 0x285   : > { %3507 = vmatpush1.bf16.msra.mxu0 %v4884_v5 }
 0x286   : > { %3509 = vmatprep.subr.bf16.mxu0 %v4890_v60 }
 0x289   : > { %3511 = vmatpush1.bf16.msra.mxu0 %v4895_v44 }
 0x28a   : > { %3513 = vmatprep.subr.bf16.mxu0 %v3512_v23  ;;  %v2705_v23 = vld [vmem:[%s4955_s27] sm:$0xff] }
 0x28c   : > { %2273 = vmatmul.mubr.f32.vlgmr.msra.gmra.mrb[4].mxu0 %v1923_v55 }
 0x28d   : > { %3515 = vmatpush1.bf16.msra.mxu0 %v3514_v22  ;;  %2391 = vmatprep.mubr.f32.mxu0 %v3587_v56  ;;  %v2706_v22 = vld [vmem:[%s4955_s27 + $0x8] sm:$0xff] }
 0x28e   : > { %3517 = vmatprep.subr.bf16.mxu0 %v3516_v21 }
 0x291   : > { %3519 = vmatpush1.bf16.msra.mxu0 %v3518_v47  ;;  %v3573_v47 = vld [vmem:[%s3627_s20] sm:$0xff] }
 0x292   : > { %3521 = vmatprep.subr.bf16.mxu0 %v3520_v6 }
 0x295   : > { %3523 = vmatpush1.bf16.msra.mxu0 %v3522_v49 }
 0x296   : > { %3525 = vmatprep.subr.bf16.mxu0 %v3524_v57 }
 0x299   : > { %3527 = vmatpush1.bf16.msra.mxu0 %v3526_v8 }
 0x29a   : > { %3529 = vmatprep.subr.bf16.mxu0 %v4844_v53 }
 0x29c   : > { %2393 = vmatmul.mubr.f32.vlgmr.msra.gmra.mrb[4].mxu0 %v1921_v61 }
 0x29d   : > { %3531 = vmatpush1.bf16.msra.mxu0 %v4852_v34  ;;  %2479 = vmatprep.mubr.f32.mxu0 %v3587_v56 }
 0x29e   : > { %3533 = vmatprep.subr.bf16.mxu0 %v4860_v50 }
 0x2a1   : > { %3535 = vmatpush1.bf16.msra.mxu0 %v4866_v14 }
 0x2a2   : > { %3537 = vmatprep.subr.bf16.mxu0 %v4874_v62 }
 0x2a5   : > { %3539 = vmatpush1.bf16.msra.mxu0 %v4884_v5 }
 0x2a6   : > { %3541 = vmatprep.subr.bf16.mxu0 %v4890_v60  ;;  %v5519_v60 = vld [vmem:[#allocation65_spill] sm:$0xff] }
 0x2a7   : > { %v2509_v27 = vsub.s32 0, %v5519_v60 }
 0x2a9   : > { %3543 = vmatpush1.bf16.msra.mxu0 %v4895_v44 }
 0x2ac   : > { %2481 = vmatmul.mubr.f32.vlgmr.msra.gmra.mrb[4].mxu0 %v1921_v61 }
 0x347   : > { %v1927_v32 = vpop.f32.mrb[8].mxu1 }
 0x348   : > { %v1929_v53 = vpop.f32.mrb[9].mxu1 }
 0x37f   : > { %v2482_v11 = vpop.f32.mrb[4].mxu0 }
 0x380   : > { %v3544_v39 = vadd.f32 %v2482_v11, %v1927_v32  ;;  %v2484_v34 = vpop.f32.mrb[5].mxu0  ;;  %v2718_v11 = vld [vmem:[%s4955_s27 + $0x68] sm:$0xff] }
 0x381   : > { %v3545_v52 = vadd.f32 %v2484_v34, %v1929_v53  ;;  %v2717_v53 = vld [vmem:[%s4955_s27 + $0x60] sm:$0xff] }
 0x382   : > { %v2489_v56 = vrot.slane %v3544_v39, 1  ;;  %v5520_v34 = vld [vmem:[#allocation10_spill] sm:$0xff] }
 0x383   : > { %v2490_v41 = vrot.slane %v3545_v52, 1 }
 0x384   : > { %v2493_v10 = vadd.f32 %v3544_v39, %v2489_v56  ;;  %v5521_v56 = vld [vmem:[#allocation11_spill] sm:$0xff] }
 0x385   : > { %v2494_v5 = vadd.f32 %v3545_v52, %v2490_v41  ;;  %v5523_v41 = vld [vmem:[#allocation21_spill] sm:$0xff] }
 0x386   : > { %v3039_v50 = vmul.f32 -1.442695, %v2493_v10 }
 0x387   : > { %v3040_v37 = vmul.f32 -1.442695, %v2494_v5 }
 0x388   : > { %3563 = vpow2.f32 %v3039_v50  ;;  %v5522_v50 = vld [vmem:[#allocation20_spill] sm:$0xff] }
 0x392   : > { %v3564_v14 = vpop.eup %3563 }
 0x393   : > { %v2501_v62 = vadd.f32 1.0, %v3564_v14 }
 0x395   : > { %3565 = vrcp.f32 %v2501_v62 }
 0x396   : > { %3567 = vpow2.f32 %v3040_v37 }
 0x39f   : > { %v3566_v44 = vpop.eup %3565 }
 0x3a0   : > { %v2510_v36 = vrot.slane %v3566_v44, %v2509_v27  ;;  %v3568_v33 = vpop.eup %3567 }
 0x3a1   : > { %v2502_v16 = vadd.f32 1.0, %v3568_v33 }
 0x3a2   : > { %2516 = vbcast.lane.b32.xlu1 %v2510_v36, 264  ;;  %2512 = vbcast.lane.b32.xlu0 %v2510_v36, 256 }
 0x3a3   : > { %3569 = vrcp.f32 %v2502_v16 }
 0x3a6   : > { %2520 = vbcast.lane.b32.xlu1 %v2510_v36, 272  ;;  %2528 = vbcast.lane.b32.xlu0 %v2510_v36, 288 }
 0x3aa   : > { %2524 = vbcast.lane.b32.xlu1 %v2510_v36, 280  ;;  %2536 = vbcast.lane.b32.xlu0 %v2510_v36, 304 }
 0x3ad   : > { %v3570_v7 = vpop.eup %3569 }
 0x3ae   : > { %2532 = vbcast.lane.b32.xlu1 %v2510_v36, 296  ;;  %2544 = vbcast.lane.b32.xlu0 %v2510_v36, 320  ;;  %v2577_v12 = vrot.slane %v3570_v7, %v2509_v27  ;;  %v2715_v7 = vld [vmem:[%s4955_s27 + $0x50] sm:$0xff] }
 0x3b2   : > { %2540 = vbcast.lane.b32.xlu1 %v2510_v36, 312  ;;  %2552 = vbcast.lane.b32.xlu0 %v2510_v36, 336 }
 0x3b6   : > { %2548 = vbcast.lane.b32.xlu1 %v2510_v36, 328  ;;  %2560 = vbcast.lane.b32.xlu0 %v2510_v36, 352 }
 0x3ba   : > { %2556 = vbcast.lane.b32.xlu1 %v2510_v36, 344  ;;  %2568 = vbcast.lane.b32.xlu0 %v2510_v36, 368 }
 0x3be   : > { %2564 = vbcast.lane.b32.xlu1 %v2510_v36, 360  ;;  %2579 = vbcast.lane.b32.xlu0 %v2577_v12, 256 }
 0x3c2   : > { %2572 = vbcast.lane.b32.xlu1 %v2510_v36, 376  ;;  %2587 = vbcast.lane.b32.xlu0 %v2577_v12, 272 }
 0x3c6   : > { %2583 = vbcast.lane.b32.xlu1 %v2577_v12, 264  ;;  %2595 = vbcast.lane.b32.xlu0 %v2577_v12, 288 }
 0x3ca   : > { %2591 = vbcast.lane.b32.xlu1 %v2577_v12, 280  ;;  %2603 = vbcast.lane.b32.xlu0 %v2577_v12, 304 }
 0x3ce   : > { %2599 = vbcast.lane.b32.xlu1 %v2577_v12, 296  ;;  %2611 = vbcast.lane.b32.xlu0 %v2577_v12, 320 }
 0x3d2   : > { %2607 = vbcast.lane.b32.xlu1 %v2577_v12, 312  ;;  %2619 = vbcast.lane.b32.xlu0 %v2577_v12, 336 }
 0x3d6   : > { %2615 = vbcast.lane.b32.xlu1 %v2577_v12, 328  ;;  %2627 = vbcast.lane.b32.xlu0 %v2577_v12, 352 }
 0x3da   : > { %2623 = vbcast.lane.b32.xlu1 %v2577_v12, 344  ;;  %2635 = vbcast.lane.b32.xlu0 %v2577_v12, 368 }
 0x3de   : > { %2631 = vbcast.lane.b32.xlu1 %v2577_v12, 360 }
 0x3e2   : > { %2639 = vbcast.lane.b32.xlu1 %v2577_v12, 376 }
 0x414   : > { %v2517_v51 = vpop.permute.xlu1 %2516  ;;  %v2513_v43 = vpop.permute.xlu0 %2512 }
 0x415   : > { %v2643_v21 = vmul.f32 %v3571_v31, %v2517_v51  ;;  %v2644_v54 = vmul.f32 %v3572_v15, %v2517_v51  ;;  %v2641_v63 = vmul.f32 %v3573_v47, %v2513_v43  ;;  %v2642_v6 = vmul.f32 %v3574_v48, %v2513_v43  ;;  %v2716_v43 = vld [vmem:[%s4955_s27 + $0x58] sm:$0xff] }
 0x417   : > { %v2771_v4 = vmul.f32 %v2707_v26, %v2643_v21  ;;  %v2772_v49 = vmul.f32 %v2708_v25, %v2644_v54  ;;  %v2769_v57 = vmul.f32 %v2705_v23, %v2641_v63  ;;  %v2770_v8 = vmul.f32 %v2706_v22, %v2642_v6  ;;  %v2722_v21 = vld [vmem:[%s4955_s27 + $0x88] sm:$0xff] }
 0x418   : > { %v2521_v58 = vpop.permute.xlu1 %2520  ;;  %v2529_v46 = vpop.permute.xlu0 %2528 }
 0x419   : > { %v2835_v17 = vadd.f32 %v3571_v31, %v2771_v4  ;;  %v2836_v13 = vadd.f32 %v3572_v15, %v2772_v49  ;;  %v2833_v1 = vadd.f32 %v3573_v47, %v2769_v57  ;;  %v2834_v29 = vadd.f32 %v3574_v48, %v2770_v8  ;;  %v2721_v31 = vld [vmem:[%s4955_s27 + $0x80] sm:$0xff]  ;;  %v5524_v15 = vld [vmem:[#allocation16_spill] sm:$0xff]  ;;  %v5525_v47 = vld [vmem:[#allocation17_spill] sm:$0xff] }
 0x41a   : > { %v2645_v19 = vmul.f32 %v3575_v20, %v2521_v58  ;;  %v2646_v24 = vmul.f32 %v3576_v18, %v2521_v58  ;;  %v2649_v2 = vmul.f32 %v3577_v3, %v2529_v46  ;;  %v2650_v30 = vmul.f32 %v3578_v42, %v2529_v46  ;;  %v5526_v48 = vld [vmem:[#allocation28_spill] sm:$0xff]  ;;  %v5527_v4 = vld [vmem:[#allocation29_spill] sm:$0xff] }
 0x41b   : > { %2899 = vst [vmem:[%s4969_s30 + $0x10] sm:$0xff] %v2835_v17  ;;  %2900 = vst [vmem:[%s4969_s30 + $0x18] sm:$0xff] %v2836_v13  ;;  %v2719_v57 = vld [vmem:[%s4955_s27 + $0x70] sm:$0xff]  ;;  %v2720_v17 = vld [vmem:[%s4955_s27 + $0x78] sm:$0xff] }
 0x41c   : > { %2897 = vst [vmem:[%s4969_s30] sm:$0xff] %v2833_v1  ;;  %2898 = vst [vmem:[%s4969_s30 + $0x8] sm:$0xff] %v2834_v29  ;;  %v2773_v61 = vmul.f32 %v2709_v28, %v2645_v19  ;;  %v2774_v9 = vmul.f32 %v2710_v35, %v2646_v24  ;;  %v2777_v55 = vmul.f32 %v2713_v45, %v2649_v2  ;;  %v2525_v32 = vpop.permute.xlu1 %2524  ;;  %v2537_v39 = vpop.permute.xlu0 %2536  ;;  %v2725_v1 = vld [vmem:[%s4955_s27 + $0xa0] sm:$0xff]  ;;  %v2726_v29 = vld [vmem:[%s4955_s27 + $0xa8] sm:$0xff] }
 0x41d   : > { %v2778_v59 = vmul.f32 %v2714_v40, %v2650_v30  ;;  %v2647_v52 = vmul.f32 %v2525_v32, %v5520_v34  ;;  %v2648_v10 = vmul.f32 %v2525_v32, %v5521_v56  ;;  %v2653_v14 = vmul.f32 %v2537_v39, %v5522_v50  ;;  %v5528_v45 = vld [vmem:[#allocation24_spill] sm:$0xff] }
 0x41e   : > { %v2654_v62 = vmul.f32 %v2537_v39, %v5523_v41  ;;  %v2837_v5 = vadd.f32 %v3575_v20, %v2773_v61  ;;  %v2838_v37 = vadd.f32 %v3576_v18, %v2774_v9  ;;  %v2841_v60 = vadd.f32 %v3577_v3, %v2777_v55  ;;  %v5529_v20 = vld [vmem:[#allocation25_spill] sm:$0xff]  ;;  %v5530_v18 = vld [vmem:[#allocation36_spill] sm:$0xff] }
 0x41f   : > { %v2842_v27 = vadd.f32 %v3578_v42, %v2778_v59  ;;  %v2775_v44 = vmul.f32 %v2711_v38, %v2647_v52  ;;  %v2776_v36 = vmul.f32 %v2712_v0, %v2648_v10  ;;  %v2781_v33 = vmul.f32 %v2717_v53, %v2653_v14  ;;  %v5531_v3 = vld [vmem:[#allocation37_spill] sm:$0xff]  ;;  %v2723_v32 = vld [vmem:[%s4955_s27 + $0x90] sm:$0xff]  ;;  %v2730_v14 = vld [vmem:[%s4955_s27 + $0xc8] sm:$0xff] }
 0x420   : > { %v2782_v16 = vmul.f32 %v2718_v11, %v2654_v62  ;;  %2901 = vst [vmem:[%s4969_s30 + $0x20] sm:$0xff] %v2837_v5  ;;  %2902 = vst [vmem:[%s4969_s30 + $0x28] sm:$0xff] %v2838_v37  ;;  %v2533_v12 = vpop.permute.xlu1 %2532  ;;  %v2545_v26 = vpop.permute.xlu0 %2544  ;;  %v2724_v10 = vld [vmem:[%s4955_s27 + $0x98] sm:$0xff] }
 0x421   : > { %2905 = vst [vmem:[%s4969_s30 + $0x40] sm:$0xff] %v2841_v60  ;;  %2906 = vst [vmem:[%s4969_s30 + $0x48] sm:$0xff] %v2842_v27  ;;  %v2839_v25 = vadd.f32 %v2775_v44, %v5520_v34  ;;  %v2840_v51 = vadd.f32 %v2776_v36, %v5521_v56  ;;  %v2845_v23 = vadd.f32 %v2781_v33, %v5522_v50  ;;  %v2729_v50 = vld [vmem:[%s4955_s27 + $0xc0] sm:$0xff]  ;;  %v5533_v5 = vld [vmem:[#allocation33_spill] sm:$0xff] }
 0x422   : > { %v2846_v22 = vadd.f32 %v2782_v16, %v5523_v41  ;;  %v2651_v54 = vmul.f32 %v2533_v12, %v5524_v15  ;;  %v2652_v63 = vmul.f32 %v2533_v12, %v5525_v47  ;;  %v2657_v6 = vmul.f32 %v2545_v26, %v5526_v48  ;;  %v5532_v41 = vld [vmem:[#allocation32_spill] sm:$0xff]  ;;  %v5535_v44 = vld [vmem:[#allocation45_spill] sm:$0xff] }
 0x423   : > { %v2658_v49 = vmul.f32 %v2545_v26, %v5527_v4  ;;  %2903 = vst [vmem:[%s4969_s30 + $0x30] sm:$0xff] %v2839_v25  ;;  %2904 = vst [vmem:[%s4969_s30 + $0x38] sm:$0xff] %v2840_v51  ;;  %v5534_v60 = vld [vmem:[#allocation44_spill] sm:$0xff]  ;;  %v2728_v25 = vld [vmem:[%s4955_s27 + $0xb8] sm:$0xff] }
 0x424   : > { %2909 = vst [vmem:[%s4969_s30 + $0x60] sm:$0xff] %v2845_v23  ;;  %2910 = vst [vmem:[%s4969_s30 + $0x68] sm:$0xff] %v2846_v22  ;;  %v2779_v8 = vmul.f32 %v2715_v7, %v2651_v54  ;;  %v2780_v28 = vmul.f32 %v2716_v43, %v2652_v63  ;;  %v2785_v58 = vmul.f32 %v2721_v31, %v2657_v6  ;;  %v2541_v13 = vpop.permute.xlu1 %2540  ;;  %v2553_v35 = vpop.permute.xlu0 %2552  ;;  %v2727_v33 = vld [vmem:[%s4955_s27 + $0xb0] sm:$0xff]  ;;  %v2733_v23 = vld [vmem:[%s4955_s27 + $0xe0] sm:$0xff] }
 0x425   : > { %v2786_v46 = vmul.f32 %v2722_v21, %v2658_v49  ;;  %v2655_v40 = vmul.f32 %v2541_v13, %v5528_v45  ;;  %v2656_v19 = vmul.f32 %v2541_v13, %v5529_v20  ;;  %v2661_v24 = vmul.f32 %v2553_v35, %v5530_v18  ;;  %v2734_v22 = vld [vmem:[%s4955_s27 + $0xe8] sm:$0xff]  ;;  %v5536_v31 = vld [vmem:[#allocation40_spill] sm:$0xff] }
 0x426   : > { %v2662_v2 = vmul.f32 %v2553_v35, %v5531_v3  ;;  %v2843_v42 = vadd.f32 %v2779_v8, %v5524_v15  ;;  %v2844_v30 = vadd.f32 %v2780_v28, %v5525_v47  ;;  %v2849_v38 = vadd.f32 %v2785_v58, %v5526_v48  ;;  %v5537_v15 = vld [vmem:[#allocation41_spill] sm:$0xff]  ;;  %v5538_v47 = vld [vmem:[#allocation52_spill] sm:$0xff] }
 0x427   : > { %v2850_v61 = vadd.f32 %v2786_v46, %v5527_v4  ;;  %v2783_v9 = vmul.f32 %v2719_v57, %v2655_v40  ;;  %v2784_v55 = vmul.f32 %v2720_v17, %v2656_v19  ;;  %v2789_v59 = vmul.f32 %v2725_v1, %v2661_v24  ;;  %v5539_v48 = vld [vmem:[#allocation53_spill] sm:$0xff]  ;;  %v2731_v13 = vld [vmem:[%s4955_s27 + $0xd0] sm:$0xff]  ;;  %v2738_v24 = vld [vmem:[%s4955_s27 + $0x108] sm:$0xff] }
 0x428   : > { %v2790_v0 = vmul.f32 %v2726_v29, %v2662_v2  ;;  %2907 = vst [vmem:[%s4969_s30 + $0x50] sm:$0xff] %v2843_v42  ;;  %2908 = vst [vmem:[%s4969_s30 + $0x58] sm:$0xff] %v2844_v30  ;;  %v2549_v53 = vpop.permute.xlu1 %2548  ;;  %v2561_v11 = vpop.permute.xlu0 %2560  ;;  %v2732_v19 = vld [vmem:[%s4955_s27 + $0xd8] sm:$0xff] }
 0x429   : > { %2913 = vst [vmem:[%s4969_s30 + $0x80] sm:$0xff] %v2849_v38  ;;  %2914 = vst [vmem:[%s4969_s30 + $0x88] sm:$0xff] %v2850_v61  ;;  %v2847_v39 = vadd.f32 %v2783_v9, %v5528_v45  ;;  %v2848_v34 = vadd.f32 %v2784_v55, %v5529_v20  ;;  %v2853_v52 = vadd.f32 %v2789_v59, %v5530_v18  ;;  %v2737_v18 = vld [vmem:[%s4955_s27 + $0x100] sm:$0xff]  ;;  %v5541_v42 = vld [vmem:[#allocation49_spill] sm:$0xff] }
 0x42a   : > { %v2854_v56 = vadd.f32 %v2790_v0, %v5531_v3  ;;  %v2659_v62 = vmul.f32 %v2549_v53, %v5532_v41  ;;  %v2660_v37 = vmul.f32 %v2549_v53, %v5533_v5  ;;  %v2665_v27 = vmul.f32 %v2561_v11, %v5534_v60  ;;  %v5540_v3 = vld [vmem:[#allocation48_spill] sm:$0xff]  ;;  %v5542_v38 = vld [vmem:[#allocation2_spill] sm:$0xff]  ;;  %v5543_v9 = vld [vmem:[#allocation3_spill] sm:$0xff] }
 0x42b   : > { %v2666_v36 = vmul.f32 %v2561_v11, %v5535_v44  ;;  %2911 = vst [vmem:[%s4969_s30 + $0x70] sm:$0xff] %v2847_v39  ;;  %2912 = vst [vmem:[%s4969_s30 + $0x78] sm:$0xff] %v2848_v34  ;;  %v2735_v59 = vld [vmem:[%s4955_s27 + $0xf0] sm:$0xff]  ;;  %v2736_v39 = vld [vmem:[%s4955_s27 + $0xf8] sm:$0xff] }
 0x42c   : > { %2917 = vst [vmem:[%s4969_s30 + $0xa0] sm:$0xff] %v2853_v52  ;;  %2918 = vst [vmem:[%s4969_s30 + $0xa8] sm:$0xff] %v2854_v56  ;;  %v2787_v16 = vmul.f32 %v2723_v32, %v2659_v62  ;;  %v2788_v7 = vmul.f32 %v2724_v10, %v2660_v37  ;;  %v2793_v12 = vmul.f32 %v2729_v50, %v2665_v27  ;;  %v2557_v51 = vpop.permute.xlu1 %2556  ;;  %v2569_v43 = vpop.permute.xlu0 %2568  ;;  %v2741_v52 = vld [vmem:[%s4955_s27 + $0x120] sm:$0xff]  ;;  %v2742_v56 = vld [vmem:[%s4955_s27 + $0x128] sm:$0xff] }
 0x42d   : > { %v2794_v26 = vmul.f32 %v2730_v14, %v2666_v36  ;;  %v2663_v21 = vmul.f32 %v2557_v51, %v5536_v31  ;;  %v2664_v54 = vmul.f32 %v2557_v51, %v5537_v15  ;;  %v2669_v63 = vmul.f32 %v2569_v43, %v5538_v47  ;;  %v5544_v50 = vld [vmem:[#allocation56_spill] sm:$0xff] }
 0x42e   : > { %v2670_v6 = vmul.f32 %v2569_v43, %v5539_v48  ;;  %v2851_v4 = vadd.f32 %v2787_v16, %v5532_v41  ;;  %v2852_v49 = vadd.f32 %v2788_v7, %v5533_v5  ;;  %v2857_v57 = vadd.f32 %v2793_v12, %v5534_v60  ;;  %v5545_v41 = vld [vmem:[#allocation57_spill] sm:$0xff]  ;;  %v5546_v5 = vld [vmem:[#allocation6_spill] sm:$0xff]  ;;  %v5547_v60 = vld [vmem:[#allocation7_spill] sm:$0xff] }
 0x42f   : > { %v2858_v8 = vadd.f32 %v2794_v26, %v5535_v44  ;;  %v2791_v28 = vmul.f32 %v2727_v33, %v2663_v21  ;;  %v2792_v58 = vmul.f32 %v2728_v25, %v2664_v54  ;;  %v2797_v46 = vmul.f32 %v2733_v23, %v2669_v63  ;;  %v2739_v51 = vld [vmem:[%s4955_s27 + $0x110] sm:$0xff]  ;;  %v2740_v54 = vld [vmem:[%s4955_s27 + $0x118] sm:$0xff]  ;;  %v2746_v63 = vld [vmem:[%s4955_s27 + $0x148] sm:$0xff] }
 0x430   : > { %v2798_v17 = vmul.f32 %v2734_v22, %v2670_v6  ;;  %2915 = vst [vmem:[%s4969_s30 + $0x90] sm:$0xff] %v2851_v4  ;;  %2916 = vst [vmem:[%s4969_s30 + $0x98] sm:$0xff] %v2852_v49  ;;  %v2565_v1 = vpop.permute.xlu1 %2564  ;;  %v2580_v29 = vpop.permute.xlu0 %2579  ;;  %v5549_v4 = vld [vmem:[#allocation5_spill] sm:$0xff] }
 0x431   : > { %2921 = vst [vmem:[%s4969_s30 + $0xc0] sm:$0xff] %v2857_v57  ;;  %2922 = vst [vmem:[%s4969_s30 + $0xc8] sm:$0xff] %v2858_v8  ;;  %v2855_v35 = vadd.f32 %v2791_v28, %v5536_v31  ;;  %v2856_v45 = vadd.f32 %v2792_v58, %v5537_v15  ;;  %v2861_v40 = vadd.f32 %v2797_v46, %v5538_v47  ;;  %v2745_v47 = vld [vmem:[%s4955_s27 + $0x140] sm:$0xff]  ;;  %v5550_v57 = vld [vmem:[#allocation12_spill] sm:$0xff] }
 0x432   : > { %v2862_v20 = vadd.f32 %v2798_v17, %v5539_v48  ;;  %v2667_v2 = vmul.f32 %v2565_v1, %v5540_v3  ;;  %v2668_v30 = vmul.f32 %v2565_v1, %v5541_v42  ;;  %v2673_v61 = vmul.f32 %v2580_v29, %v5542_v38  ;;  %v5548_v48 = vld [vmem:[#allocation4_spill] sm:$0xff]  ;;  %v5551_v28 = vld [vmem:[#allocation13_spill] sm:$0xff] }
 0x433   : > { %v2674_v55 = vmul.f32 %v2580_v29, %v5543_v9  ;;  %2919 = vst [vmem:[%s4969_s30 + $0xb0] sm:$0xff] %v2855_v35  ;;  %2920 = vst [vmem:[%s4969_s30 + $0xb8] sm:$0xff] %v2856_v45  ;;  %v2743_v46 = vld [vmem:[%s4955_s27 + $0x130] sm:$0xff]  ;;  %v2744_v35 = vld [vmem:[%s4955_s27 + $0x138] sm:$0xff] }
 0x434   : > { %2925 = vst [vmem:[%s4969_s30 + $0xe0] sm:$0xff] %v2861_v40  ;;  %2926 = vst [vmem:[%s4969_s30 + $0xe8] sm:$0xff] %v2862_v20  ;;  %v2795_v0 = vmul.f32 %v2731_v13, %v2667_v2  ;;  %v2796_v32 = vmul.f32 %v2732_v19, %v2668_v30  ;;  %v2801_v53 = vmul.f32 %v2737_v18, %v2673_v61  ;;  %v2573_v34 = vpop.permute.xlu1 %2572  ;;  %v2588_v10 = vpop.permute.xlu0 %2587  ;;  %v2749_v40 = vld [vmem:[%s4955_s27 + $0x160] sm:$0xff]  ;;  %v2750_v20 = vld [vmem:[%s4955_s27 + $0x168] sm:$0xff] }
 0x435   : > { %v2802_v11 = vmul.f32 %v2738_v24, %v2674_v55  ;;  %v2671_v14 = vmul.f32 %v2573_v34, %v5544_v50  ;;  %v2672_v62 = vmul.f32 %v2573_v34, %v5545_v41  ;;  %v2677_v37 = vmul.f32 %v2588_v10, %v5546_v5  ;;  %v5552_v18 = vld [vmem:[#allocation8_spill] sm:$0xff] }
 0x436   : > { %v2678_v27 = vmul.f32 %v2588_v10, %v5547_v60  ;;  %v2859_v44 = vadd.f32 %v2795_v0, %v5540_v3  ;;  %v2860_v36 = vadd.f32 %v2796_v32, %v5541_v42  ;;  %v2865_v33 = vadd.f32 %v2801_v53, %v5542_v38  ;;  %v5553_v3 = vld [vmem:[#allocation9_spill] sm:$0xff]  ;;  %v5554_v42 = vld [vmem:[#allocation18_spill] sm:$0xff]  ;;  %v5555_v38 = vld [vmem:[#allocation19_spill] sm:$0xff] }
 0x437   : > { %v2866_v16 = vadd.f32 %v2802_v11, %v5543_v9  ;;  %v2799_v7 = vmul.f32 %v2735_v59, %v2671_v14  ;;  %v2800_v12 = vmul.f32 %v2736_v39, %v2672_v62  ;;  %v2805_v26 = vmul.f32 %v2741_v52, %v2677_v37  ;;  %v2747_v34 = vld [vmem:[%s4955_s27 + $0x150] sm:$0xff]  ;;  %v2748_v62 = vld [vmem:[%s4955_s27 + $0x158] sm:$0xff]  ;;  %v2754_v37 = vld [vmem:[%s4955_s27 + $0x188] sm:$0xff] }
 0x438   : > { %v2806_v25 = vmul.f32 %v2742_v56, %v2678_v27  ;;  %2923 = vst [vmem:[%s4969_s30 + $0xd0] sm:$0xff] %v2859_v44  ;;  %2924 = vst [vmem:[%s4969_s30 + $0xd8] sm:$0xff] %v2860_v36  ;;  %v2584_v23 = vpop.permute.xlu1 %2583  ;;  %v2596_v22 = vpop.permute.xlu0 %2595  ;;  %v5557_v44 = vld [vmem:[#allocation15_spill] sm:$0xff] }
 0x439   : > { %2929 = vst [vmem:[%s4969_s30 + $0x100] sm:$0xff] %v2865_v33  ;;  %2930 = vst [vmem:[%s4969_s30 + $0x108] sm:$0xff] %v2866_v16  ;;  %v2863_v43 = vadd.f32 %v2799_v7, %v5544_v50  ;;  %v2864_v31 = vadd.f32 %v2800_v12, %v5545_v41  ;;  %v2869_v21 = vadd.f32 %v2805_v26, %v5546_v5  ;;  %v2753_v5 = vld [vmem:[%s4955_s27 + $0x180] sm:$0xff]  ;;  %v5559_v7 = vld [vmem:[#allocation27_spill] sm:$0xff] }
 0x43a   : > { %v2870_v15 = vadd.f32 %v2806_v25, %v5547_v60  ;;  %v2675_v6 = vmul.f32 %v2584_v23, %v5548_v48  ;;  %v2676_v49 = vmul.f32 %v2584_v23, %v5549_v4  ;;  %v2681_v8 = vmul.f32 %v2596_v22, %v5550_v57  ;;  %v5556_v60 = vld [vmem:[#allocation14_spill] sm:$0xff]  ;;  %v2751_v26 = vld [vmem:[%s4955_s27 + $0x170] sm:$0xff] }
 0x43b   : > { %v2682_v58 = vmul.f32 %v2596_v22, %v5551_v28  ;;  %2927 = vst [vmem:[%s4969_s30 + $0xf0] sm:$0xff] %v2863_v43  ;;  %2928 = vst [vmem:[%s4969_s30 + $0xf8] sm:$0xff] %v2864_v31  ;;  %v5558_v33 = vld [vmem:[#allocation26_spill] sm:$0xff]  ;;  %v2752_v43 = vld [vmem:[%s4955_s27 + $0x178] sm:$0xff] }
 0x43c   : > { %2933 = vst [vmem:[%s4969_s30 + $0x120] sm:$0xff] %v2869_v21  ;;  %2934 = vst [vmem:[%s4969_s30 + $0x128] sm:$0xff] %v2870_v15  ;;  %v2803_v17 = vmul.f32 %v2739_v51, %v2675_v6  ;;  %v2804_v13 = vmul.f32 %v2740_v54, %v2676_v49  ;;  %v2809_v1 = vmul.f32 %v2745_v47, %v2681_v8  ;;  %v2592_v45 = vpop.permute.xlu1 %2591  ;;  %v2604_v19 = vpop.permute.xlu0 %2603  ;;  %v2757_v21 = vld [vmem:[%s4955_s27 + $0x1a0] sm:$0xff]  ;;  %v2758_v15 = vld [vmem:[%s4955_s27 + $0x1a8] sm:$0xff] }
 0x43d   : > { %v2810_v29 = vmul.f32 %v2746_v63, %v2682_v58  ;;  %v2679_v24 = vmul.f32 %v2592_v45, %v5552_v18  ;;  %v2680_v2 = vmul.f32 %v2592_v45, %v5553_v3  ;;  %v2685_v30 = vmul.f32 %v2604_v19, %v5554_v42  ;;  %v5560_v47 = vld [vmem:[#allocation22_spill] sm:$0xff]  ;;  %v2755_v45 = vld [vmem:[%s4955_s27 + $0x190] sm:$0xff] }
 0x43e   : > { %v2686_v61 = vmul.f32 %v2604_v19, %v5555_v38  ;;  %v2867_v9 = vadd.f32 %v2803_v17, %v5548_v48  ;;  %v2868_v55 = vadd.f32 %v2804_v13, %v5549_v4  ;;  %v2873_v59 = vadd.f32 %v2809_v1, %v5550_v57  ;;  %v5561_v48 = vld [vmem:[#allocation23_spill] sm:$0xff]  ;;  %v5562_v4 = vld [vmem:[#allocation34_spill] sm:$0xff] }
 0x43f   : > { %v2874_v0 = vadd.f32 %v2810_v29, %v5551_v28  ;;  %v2807_v32 = vmul.f32 %v2743_v46, %v2679_v24  ;;  %v2808_v53 = vmul.f32 %v2744_v35, %v2680_v2  ;;  %v2813_v11 = vmul.f32 %v2749_v40, %v2685_v30  ;;  %v5563_v57 = vld [vmem:[#allocation35_spill] sm:$0xff]  ;;  %v2756_v2 = vld [vmem:[%s4955_s27 + $0x198] sm:$0xff] }
 0x440   : > { %v2814_v39 = vmul.f32 %v2750_v20, %v2686_v61  ;;  %2931 = vst [vmem:[%s4969_s30 + $0x110] sm:$0xff] %v2867_v9  ;;  %2932 = vst [vmem:[%s4969_s30 + $0x118] sm:$0xff] %v2868_v55  ;;  %v2600_v52 = vpop.permute.xlu1 %2599  ;;  %v2612_v56 = vpop.permute.xlu0 %2611  ;;  %v2762_v30 = vld [vmem:[%s4955_s27 + $0x1c8] sm:$0xff] }
 0x441   : > { %2937 = vst [vmem:[%s4969_s30 + $0x140] sm:$0xff] %v2873_v59  ;;  %2938 = vst [vmem:[%s4969_s30 + $0x148] sm:$0xff] %v2874_v0  ;;  %v2871_v10 = vadd.f32 %v2807_v32, %v5552_v18  ;;  %v2872_v50 = vadd.f32 %v2808_v53, %v5553_v3  ;;  %v2877_v14 = vadd.f32 %v2813_v11, %v5554_v42  ;;  %v2761_v42 = vld [vmem:[%s4955_s27 + $0x1c0] sm:$0xff]  ;;  %v5565_v9 = vld [vmem:[#allocation31_spill] sm:$0xff] }
 0x442   : > { %v2878_v41 = vadd.f32 %v2814_v39, %v5555_v38  ;;  %v2683_v27 = vmul.f32 %v2600_v52, %v5556_v60  ;;  %v2684_v36 = vmul.f32 %v2600_v52, %v5557_v44  ;;  %v2689_v16 = vmul.f32 %v2612_v56, %v5558_v33  ;;  %v5564_v38 = vld [vmem:[#allocation30_spill] sm:$0xff]  ;;  %v5567_v32 = vld [vmem:[#allocation43_spill] sm:$0xff]  ;;  %v2759_v11 = vld [vmem:[%s4955_s27 + $0x1b0] sm:$0xff] }
 0x443   : > { %v2690_v12 = vmul.f32 %v2612_v56, %v5559_v7  ;;  %2935 = vst [vmem:[%s4969_s30 + $0x130] sm:$0xff] %v2871_v10  ;;  %2936 = vst [vmem:[%s4969_s30 + $0x138] sm:$0xff] %v2872_v50  ;;  %v5566_v59 = vld [vmem:[#allocation42_spill] sm:$0xff]  ;;  %v2760_v10 = vld [vmem:[%s4955_s27 + $0x1b8] sm:$0xff] }
 0x444   : > { %2941 = vst [vmem:[%s4969_s30 + $0x160] sm:$0xff] %v2877_v14  ;;  %2942 = vst [vmem:[%s4969_s30 + $0x168] sm:$0xff] %v2878_v41  ;;  %v2811_v25 = vmul.f32 %v2747_v34, %v2683_v27  ;;  %v2812_v51 = vmul.f32 %v2748_v62, %v2684_v36  ;;  %v2817_v23 = vmul.f32 %v2753_v5, %v2689_v16  ;;  %v2608_v31 = vpop.permute.xlu1 %2607  ;;  %v2620_v54 = vpop.permute.xlu0 %2619  ;;  %v2765_v14 = vld [vmem:[%s4955_s27 + $0x1e0] sm:$0xff]  ;;  %v2766_v41 = vld [vmem:[%s4955_s27 + $0x1e8] sm:$0xff] }
 0x445   : > { %v2818_v22 = vmul.f32 %v2754_v37, %v2690_v12  ;;  %v2687_v63 = vmul.f32 %v2608_v31, %v5560_v47  ;;  %v2688_v6 = vmul.f32 %v2608_v31, %v5561_v48  ;;  %v2693_v49 = vmul.f32 %v2620_v54, %v5562_v4  ;;  %v5568_v5 = vld [vmem:[#allocation38_spill] sm:$0xff] }
 0x446   : > { %v2694_v8 = vmul.f32 %v2620_v54, %v5563_v57  ;;  %v2875_v28 = vadd.f32 %v2811_v25, %v5556_v60  ;;  %v2876_v58 = vadd.f32 %v2812_v51, %v5557_v44  ;;  %v2881_v46 = vadd.f32 %v2817_v23, %v5558_v33  ;;  %v5569_v60 = vld [vmem:[#allocation39_spill] sm:$0xff]  ;;  %v5570_v44 = vld [vmem:[#allocation50_spill] sm:$0xff] }
 0x447   : > { %v2882_v17 = vadd.f32 %v2818_v22, %v5559_v7  ;;  %v2815_v13 = vmul.f32 %v2751_v26, %v2687_v63  ;;  %v2816_v1 = vmul.f32 %v2752_v43, %v2688_v6  ;;  %v2821_v29 = vmul.f32 %v2757_v21, %v2693_v49  ;;  %v5571_v33 = vld [vmem:[#allocation51_spill] sm:$0xff]  ;;  %v2763_v63 = vld [vmem:[%s4955_s27 + $0x1d0] sm:$0xff]  ;;  %v5572_v6 = vld [vmem:[#allocation46_spill] sm:$0xff] }
 0x448   : > { %v2822_v35 = vmul.f32 %v2758_v15, %v2694_v8  ;;  %2939 = vst [vmem:[%s4969_s30 + $0x150] sm:$0xff] %v2875_v28  ;;  %2940 = vst [vmem:[%s4969_s30 + $0x158] sm:$0xff] %v2876_v58  ;;  %v2616_v40 = vpop.permute.xlu1 %2615  ;;  %v2628_v20 = vpop.permute.xlu0 %2627  ;;  %v5573_v49 = vld [vmem:[#allocation47_spill] sm:$0xff]  ;;  %v2767_v58 = vld [vmem:[%s4955_s27 + $0x1f0] sm:$0xff] }
 0x449   : > { %2945 = vst [vmem:[%s4969_s30 + $0x180] sm:$0xff] %v2881_v46  ;;  %2946 = vst [vmem:[%s4969_s30 + $0x188] sm:$0xff] %v2882_v17  ;;  %v2879_v19 = vadd.f32 %v2815_v13, %v5560_v47  ;;  %v2880_v18 = vadd.f32 %v2816_v1, %v5561_v48  ;;  %v2885_v24 = vadd.f32 %v2821_v29, %v5562_v4  ;;  %v2764_v48 = vld [vmem:[%s4955_s27 + $0x1d8] sm:$0xff]  ;;  %v5574_v13 = vld [vmem:[#allocation54_spill] sm:$0xff] }
 0x44a   : > { %v2886_v3 = vadd.f32 %v2822_v35, %v5563_v57  ;;  %v2691_v61 = vmul.f32 %v2616_v40, %v5564_v38  ;;  %v2692_v55 = vmul.f32 %v2616_v40, %v5565_v9  ;;  %v2697_v0 = vmul.f32 %v2628_v20, %v5566_v59  ;;  %v2768_v46 = vld [vmem:[%s4955_s27 + $0x1f8] sm:$0xff]  ;;  %v5575_v29 = vld [vmem:[#allocation55_spill] sm:$0xff] }
 0x44b   : > { %v2698_v53 = vmul.f32 %v2628_v20, %v5567_v32  ;;  %2943 = vst [vmem:[%s4969_s30 + $0x170] sm:$0xff] %v2879_v19  ;;  %2944 = vst [vmem:[%s4969_s30 + $0x178] sm:$0xff] %v2880_v18 }
 0x44c   : > { %2949 = vst [vmem:[%s4969_s30 + $0x1a0] sm:$0xff] %v2885_v24  ;;  %2950 = vst [vmem:[%s4969_s30 + $0x1a8] sm:$0xff] %v2886_v3  ;;  %v2819_v39 = vmul.f32 %v2755_v45, %v2691_v61  ;;  %v2820_v34 = vmul.f32 %v2756_v2, %v2692_v55  ;;  %v2825_v52 = vmul.f32 %v2761_v42, %v2697_v0  ;;  %v2624_v50 = vpop.permute.xlu1 %2623  ;;  %v2636_v62 = vpop.permute.xlu0 %2635 }
 0x44d   : > { %v2826_v56 = vmul.f32 %v2762_v30, %v2698_v53  ;;  %v2695_v37 = vmul.f32 %v2624_v50, %v5568_v5  ;;  %v2696_v27 = vmul.f32 %v2624_v50, %v5569_v60  ;;  %v2701_v36 = vmul.f32 %v2636_v62, %v5570_v44 }
 0x44e   : > { %v2702_v16 = vmul.f32 %v2636_v62, %v5571_v33  ;;  %v2883_v7 = vadd.f32 %v2819_v39, %v5564_v38  ;;  %v2884_v12 = vadd.f32 %v2820_v34, %v5565_v9  ;;  %v2889_v26 = vadd.f32 %v2825_v52, %v5566_v59 }
 0x44f   : > { %v2890_v25 = vadd.f32 %v2826_v56, %v5567_v32  ;;  %v2823_v51 = vmul.f32 %v2759_v11, %v2695_v37  ;;  %v2824_v23 = vmul.f32 %v2760_v10, %v2696_v27  ;;  %v2829_v22 = vmul.f32 %v2765_v14, %v2701_v36 }
 0x450   : > { %v2830_v43 = vmul.f32 %v2766_v41, %v2702_v16  ;;  %2947 = vst [vmem:[%s4969_s30 + $0x190] sm:$0xff] %v2883_v7  ;;  %2948 = vst [vmem:[%s4969_s30 + $0x198] sm:$0xff] %v2884_v12  ;;  %v2632_v31 = vpop.permute.xlu1 %2631 }
 0x451   : > { %2953 = vst [vmem:[%s4969_s30 + $0x1c0] sm:$0xff] %v2889_v26  ;;  %2954 = vst [vmem:[%s4969_s30 + $0x1c8] sm:$0xff] %v2890_v25  ;;  %v2887_v21 = vadd.f32 %v2823_v51, %v5568_v5  ;;  %v2888_v15 = vadd.f32 %v2824_v23, %v5569_v60  ;;  %v2893_v54 = vadd.f32 %v2829_v22, %v5570_v44 }
 0x452   : > { %v2894_v47 = vadd.f32 %v2830_v43, %v5571_v33  ;;  %v2699_v4 = vmul.f32 %v2632_v31, %v5572_v6  ;;  %v2700_v57 = vmul.f32 %v2632_v31, %v5573_v49 }
 0x453   : > { %2951 = vst [vmem:[%s4969_s30 + $0x1b0] sm:$0xff] %v2887_v21  ;;  %2952 = vst [vmem:[%s4969_s30 + $0x1b8] sm:$0xff] %v2888_v15 }
 0x454   : > { %2957 = vst [vmem:[%s4969_s30 + $0x1e0] sm:$0xff] %v2893_v54  ;;  %2958 = vst [vmem:[%s4969_s30 + $0x1e8] sm:$0xff] %v2894_v47  ;;  %v2827_v8 = vmul.f32 %v2763_v63, %v2699_v4  ;;  %v2828_v28 = vmul.f32 %v2764_v48, %v2700_v57  ;;  %v2640_v17 = vpop.permute.xlu1 %2639 }
 0x455   : > { %v2703_v1 = vmul.f32 %v2640_v17, %v5574_v13  ;;  %v2704_v35 = vmul.f32 %v2640_v17, %v5575_v29 }
 0x456   : > { %v2891_v45 = vadd.f32 %v2827_v8, %v5572_v6  ;;  %v2892_v40 = vadd.f32 %v2828_v28, %v5573_v49 }
 0x457   : > { %v2831_v20 = vmul.f32 %v2767_v58, %v2703_v1  ;;  %v2832_v19 = vmul.f32 %v2768_v46, %v2704_v35 }
 0x458   : > { %2955 = vst [vmem:[%s4969_s30 + $0x1d0] sm:$0xff] %v2891_v45  ;;  %2956 = vst [vmem:[%s4969_s30 + $0x1d8] sm:$0xff] %v2892_v40 }
 0x459   : > { %v2895_v18 = vadd.f32 %v2831_v20, %v5574_v13  ;;  %v2896_v24 = vadd.f32 %v2832_v19, %v5575_v29 }
 0x45b   : > { %2959 = vst [vmem:[%s4969_s30 + $0x1f0] sm:$0xff] %v2895_v18  ;;  %2960 = vst [vmem:[%s4969_s30 + $0x1f8] sm:$0xff] %v2896_v24 }
 0x45c PF: > { %s14_s15 = sadd.s32 1, %s3585_s15  }
 0x45d   : > { %p11_p4 = scmp.ge.s32.totalorder %s14_s15, 4  }
 0x45f   :  { %13 = sbr.rel (!%p11_p4) target bundleno = 1 (0x1), region = 69 }

</bundles_post_ra>
